<compile_context>
chip_gen: v5e
topology: v5e:2x2
jax: 0.10.0
libtpu: 0.0.40
codegen_flags: <defaults>
</compile_context>

<pallas_src>
import math
import jax
import jax.numpy as jnp
from jax import lax
from jax.experimental import pallas as pl
from jax.experimental.pallas import tpu as pltpu

# ----------------------------- config ---------------------------------------
B = 2            # batch
S = 8            # sequence length
H = 32           # hidden size
NH = 2           # num heads
DH = H // NH     # head dim
V = 64           # vocab size
VPAD = 128       # lane-dense padded vocab width for the output store
P = 16           # max positions
L = 2            # num layers
MLP = 4 * H      # mlp inner dim
LN_EPS = 1e-5
NEG = -1e9


# ----------------------------- in-kernel helpers -----------------------------
def _layernorm(x, g, b):
    # x: [M, H] f32, g/b: [1, H]
    mean = jnp.mean(x, axis=-1, keepdims=True)
    var = jnp.mean((x - mean) ** 2, axis=-1, keepdims=True)
    return (x - mean) * lax.rsqrt(var + LN_EPS) * g + b


def _gelu_new(h):
    # GPT-2 "gelu_new" (tanh approximation), f32 (v5e has no bf16 VPU/EUP)
    c = math.sqrt(2.0 / math.pi)
    return 0.5 * h * (1.0 + jnp.tanh(c * (h + 0.044715 * h * h * h)))


# ----------------------------- fused kernel ----------------------------------
def _gpt2_fwd_kernel(x_ref, bias_ref,
                     ln1_g_ref, ln1_b_ref, attn_w_ref, attn_b_ref,
                     proj_w_ref, proj_b_ref, ln2_g_ref, ln2_b_ref,
                     fc_w_ref, fc_b_ref, fc2_w_ref, fc2_b_ref,
                     lnf_g_ref, lnf_b_ref, out_w_ref, out_b_ref,
                     logits_ref, ctx_scratch):
    """Whole GPT-2 forward + output linear in one invocation.

    x_ref:      [B*S, H]   embedded input
    bias_ref:   [B, S, S]  combined causal + key-padding additive bias
    *_w/_b:     layer-stacked weights (leading L axis) + final ln / vocab proj
    logits_ref: [B*S, VPAD] (columns >= V are zero-padded weights)
    ctx_scratch:[B*S, H]   VMEM scratch for per-head context re-assembly
    """
    x = x_ref[...].astype(jnp.float32)          # [B*S, H]
    bias = bias_ref[...]                        # [B, S, S]
    scale = 1.0 / math.sqrt(DH)

    for l in range(L):                          # static unroll, L=2
        # ------------------ attention block ------------------
        h = _layernorm(x, ln1_g_ref[l], ln1_b_ref[l])
        qkv = jnp.dot(h, attn_w_ref[l],
                      preferred_element_type=jnp.float32) + attn_b_ref[l]  # [B*S, 3H]

        # head split + attention done in-kernel (static slices, B*NH=4 unrolled)
        for b in range(B):
            rows = slice(b * S, (b + 1) * S)
            bb = bias[b]                        # [S, S]
            for hd in range(NH):
                qh = qkv[rows, 0 * H + hd * DH: 0 * H + (hd + 1) * DH]  # [S, DH]
                kh = qkv[rows, 1 * H + hd * DH: 1 * H + (hd + 1) * DH]
                vh = qkv[rows, 2 * H + hd * DH: 2 * H + (hd + 1) * DH]
                # scores = qh @ kh.T (contraction on DH, no explicit transpose)
                s = lax.dot_general(qh, kh, (((1,), (1,)), ((), ())),
                                    preferred_element_type=jnp.float32)
                s = s * scale + bb
                s = s - jnp.max(s, axis=-1, keepdims=True)
                p = jnp.exp(s)
                p = p * pl.reciprocal(jnp.sum(p, axis=-1, keepdims=True),
                                      approx=True)
                ctx_scratch[rows, hd * DH:(hd + 1) * DH] = jnp.dot(
                    p, vh, preferred_element_type=jnp.float32)

        ctx = ctx_scratch[...]                  # [B*S, H]
        attn_out = jnp.dot(ctx, proj_w_ref[l],
                           preferred_element_type=jnp.float32) + proj_b_ref[l]
        x = x + attn_out

        # ------------------ MLP block ------------------
        h = _layernorm(x, ln2_g_ref[l], ln2_b_ref[l])
        m = _gelu_new(jnp.dot(h, fc_w_ref[l],
                              preferred_element_type=jnp.float32) + fc_b_ref[l])
        x = x + jnp.dot(m, fc2_w_ref[l],
                        preferred_element_type=jnp.float32) + fc2_b_ref[l]

    # final layernorm of GPT2Model, then the Generator's output_linear
    h = _layernorm(x, lnf_g_ref[...], lnf_b_ref[...])
    logits = jnp.dot(h, out_w_ref[...],
                     preferred_element_type=jnp.float32) + out_b_ref[...]
    logits_ref[...] = logits.astype(logits_ref.dtype)   # [B*S, VPAD] lane-dense


# One pallas_call for the whole forward: no grid, whole arrays VMEM-resident.
_fwd_call = pl.pallas_call(
    _gpt2_fwd_kernel,
    out_shape=jax.ShapeDtypeStruct((B * S, VPAD), jnp.float32),
    scratch_shapes=[pltpu.VMEM((B * S, H), jnp.float32)],
)


# ----------------------------- params ----------------------------------------
def init_params(key):
    def nrm(k, shape, scale=0.02):
        return (scale * jax.random.normal(k, shape)).astype(jnp.float32)

    ks = jax.random.split(key, 8)
    return {
        'wte': nrm(ks[0], (V, H)),
        'wpe': nrm(ks[1], (P, H), 0.01),
        # layer-stacked transformer weights (leading L axis)
        'ln1_g': jnp.ones((L, 1, H), jnp.float32),
        'ln1_b': jnp.zeros((L, 1, H), jnp.float32),
        'attn_w': nrm(ks[2], (L, H, 3 * H)),
        'attn_b': jnp.zeros((L, 1, 3 * H), jnp.float32),
        'proj_w': nrm(ks[3], (L, H, H)),
        'proj_b': jnp.zeros((L, 1, H), jnp.float32),
        'ln2_g': jnp.ones((L, 1, H), jnp.float32),
        'ln2_b': jnp.zeros((L, 1, H), jnp.float32),
        'fc_w': nrm(ks[4], (L, H, MLP)),
        'fc_b': jnp.zeros((L, 1, MLP), jnp.float32),
        'fc2_w': nrm(ks[5], (L, MLP, H)),
        'fc2_b': jnp.zeros((L, 1, H), jnp.float32),
        # final layernorm + output linear (vocab padded to 128 lanes with zeros)
        'lnf_g': jnp.ones((1, H), jnp.float32),
        'lnf_b': jnp.zeros((1, H), jnp.float32),
        'out_w': jnp.pad(nrm(ks[6], (H, V)), ((0, 0), (0, VPAD - V))),
        'out_b': jnp.zeros((1, VPAD), jnp.float32),
    }


# ----------------------------- forward ----------------------------------------
def generator_forward(params, input_ids, attention_mask):
    """GPT2Model forward + output_linear  ->  logits [B, S, V]."""
    # embedding gather + position add (plain-JAX glue)
    x0 = params['wte'][input_ids] + params['wpe'][jnp.arange(S)][None, :, :]
    x0 = x0.reshape(B * S, H)

    # single precomputed additive attention bias: causal + key padding, [B,S,S]
    qi = lax.broadcasted_iota(jnp.int32, (S, S), 0)
    ki = lax.broadcasted_iota(jnp.int32, (S, S), 1)
    causal_bias = jnp.where(ki <= qi, 0.0, NEG).astype(jnp.float32)            # [S, S]
    key_bias = ((1.0 - attention_mask.astype(jnp.float32)) * NEG)[:, None, :]  # [B, 1, S]
    attn_bias = causal_bias[None, :, :] + key_bias                             # [B, S, S]

    logits_pad = _fwd_call(
        x0, attn_bias,
        params['ln1_g'], params['ln1_b'], params['attn_w'], params['attn_b'],
        params['proj_w'], params['proj_b'], params['ln2_g'], params['ln2_b'],
        params['fc_w'], params['fc_b'], params['fc2_w'], params['fc2_b'],
        params['lnf_g'], params['lnf_b'], params['out_w'], params['out_b'])

    return logits_pad[:, :V].reshape(B, S, V)


# ----------------------------- main ------------------------------------------
if __name__ == "__main__":
    root = jax.random.PRNGKey(0)
    k_param, k_ids = jax.random.split(root)

    params = init_params(k_param)
    input_ids = jax.random.randint(k_ids, (B, S), 0, V, dtype=jnp.int32)
    # second sequence has 2 padding tokens at the end
    attention_mask = jnp.array(
        [[1] * S, [1] * (S - 2) + [0, 0]], dtype=jnp.int32)

    logits = jax.jit(generator_forward)(params, input_ids, attention_mask)
    logits = jax.block_until_ready(logits)

    assert logits.shape == (B, S, V)
    assert bool(jnp.all(jnp.isfinite(logits)))
    print("KERNEL_OK")
</pallas_src>

<mosaic_0001>
module attributes {stable_mosaic.version = 11 : i64} {
  func.func @_gpt2_fwd_kernel(%arg0: memref<16x32xf32, #tpu.memory_space<vmem>>, %arg1: memref<2x8x8xf32, #tpu.memory_space<vmem>>, %arg2: memref<2x1x32xf32, #tpu.memory_space<vmem>>, %arg3: memref<2x1x32xf32, #tpu.memory_space<vmem>>, %arg4: memref<2x32x96xf32, #tpu.memory_space<vmem>>, %arg5: memref<2x1x96xf32, #tpu.memory_space<vmem>>, %arg6: memref<2x32x32xf32, #tpu.memory_space<vmem>>, %arg7: memref<2x1x32xf32, #tpu.memory_space<vmem>>, %arg8: memref<2x1x32xf32, #tpu.memory_space<vmem>>, %arg9: memref<2x1x32xf32, #tpu.memory_space<vmem>>, %arg10: memref<2x32x128xf32, #tpu.memory_space<vmem>>, %arg11: memref<2x1x128xf32, #tpu.memory_space<vmem>>, %arg12: memref<2x128x32xf32, #tpu.memory_space<vmem>>, %arg13: memref<2x1x32xf32, #tpu.memory_space<vmem>>, %arg14: memref<1x32xf32, #tpu.memory_space<vmem>>, %arg15: memref<1x32xf32, #tpu.memory_space<vmem>>, %arg16: memref<32x128xf32, #tpu.memory_space<vmem>>, %arg17: memref<1x128xf32, #tpu.memory_space<vmem>>, %arg18: memref<16x128xf32, #tpu.memory_space<vmem>>, %arg19: memref<16x32xf32, #tpu.memory_space<vmem>>) attributes {dimension_semantics = [], scalar_prefetch = 0 : i64, scratch_operands = 1 : i64, tpu.core_type = #tpu.core_type<tc>} {
    %c0 = arith.constant 0 : index
    %c0_0 = arith.constant 0 : index
    %0 = vector.load %arg0[%c0, %c0_0] : memref<16x32xf32, #tpu.memory_space<vmem>>, vector<16x32xf32>
    %c0_1 = arith.constant 0 : index
    %c0_2 = arith.constant 0 : index
    %c0_3 = arith.constant 0 : index
    %1 = vector.load %arg1[%c0_1, %c0_2, %c0_3] : memref<2x8x8xf32, #tpu.memory_space<vmem>>, vector<2x8x8xf32>
    %c0_4 = arith.constant 0 : index
    %c0_5 = arith.constant 0 : index
    %c0_6 = arith.constant 0 : index
    %2 = vector.load %arg2[%c0_4, %c0_5, %c0_6] : memref<2x1x32xf32, #tpu.memory_space<vmem>>, vector<1x1x32xf32>
    %3 = vector.shape_cast %2 : vector<1x1x32xf32> to vector<1x32xf32>
    %c0_7 = arith.constant 0 : index
    %c0_8 = arith.constant 0 : index
    %c0_9 = arith.constant 0 : index
    %4 = vector.load %arg3[%c0_7, %c0_8, %c0_9] : memref<2x1x32xf32, #tpu.memory_space<vmem>>, vector<1x1x32xf32>
    %5 = vector.shape_cast %4 : vector<1x1x32xf32> to vector<1x32xf32>
    %cst = arith.constant dense<0.000000e+00> : vector<16xf32>
    %6 = vector.multi_reduction <add>, %0, %cst [1] : vector<16x32xf32> to vector<16xf32>
    %7 = vector.shape_cast %6 : vector<16xf32> to vector<16x1xf32>
    %cst_10 = arith.constant 3.200000e+01 : f32
    %8 = vector.broadcast %cst_10 : f32 to vector<16x1xf32>
    %9 = arith.divf %7, %8 : vector<16x1xf32>
    %10 = vector.broadcast %9 : vector<16x1xf32> to vector<16x32xf32>
    %11 = arith.subf %0, %10 : vector<16x32xf32>
    %12 = arith.mulf %11, %11 : vector<16x32xf32>
    %cst_11 = arith.constant dense<0.000000e+00> : vector<16xf32>
    %13 = vector.multi_reduction <add>, %12, %cst_11 [1] : vector<16x32xf32> to vector<16xf32>
    %14 = vector.shape_cast %13 : vector<16xf32> to vector<16x1xf32>
    %cst_12 = arith.constant 3.200000e+01 : f32
    %15 = vector.broadcast %cst_12 : f32 to vector<16x1xf32>
    %16 = arith.divf %14, %15 : vector<16x1xf32>
    %17 = vector.broadcast %9 : vector<16x1xf32> to vector<16x32xf32>
    %18 = arith.subf %0, %17 : vector<16x32xf32>
    %cst_13 = arith.constant 9.99999974E-6 : f32
    %19 = vector.broadcast %cst_13 : f32 to vector<16x1xf32>
    %20 = arith.addf %16, %19 : vector<16x1xf32>
    %21 = math.rsqrt %20 : vector<16x1xf32>
    %22 = vector.broadcast %21 : vector<16x1xf32> to vector<16x32xf32>
    %23 = arith.mulf %18, %22 : vector<16x32xf32>
    %24 = vector.broadcast %3 : vector<1x32xf32> to vector<16x32xf32>
    %25 = arith.mulf %23, %24 : vector<16x32xf32>
    %26 = vector.broadcast %5 : vector<1x32xf32> to vector<16x32xf32>
    %27 = arith.addf %25, %26 : vector<16x32xf32>
    %c0_14 = arith.constant 0 : index
    %c0_15 = arith.constant 0 : index
    %c0_16 = arith.constant 0 : index
    %28 = vector.load %arg4[%c0_14, %c0_15, %c0_16] : memref<2x32x96xf32, #tpu.memory_space<vmem>>, vector<1x32x96xf32>
    %29 = vector.shape_cast %28 : vector<1x32x96xf32> to vector<32x96xf32>
    %cst_17 = arith.constant dense<0.000000e+00> : vector<16x96xf32>
    %30 = tpu.matmul %27, %29, %cst_17 {dimension_numbers = #tpu.dot_dimension_numbers<[1], [0], [0], [1], [0, 0, 1, 1], [], []>} : vector<16x32xf32>, vector<32x96xf32>, vector<16x96xf32> -> vector<16x96xf32>
    %c0_18 = arith.constant 0 : index
    %c0_19 = arith.constant 0 : index
    %c0_20 = arith.constant 0 : index
    %31 = vector.load %arg5[%c0_18, %c0_19, %c0_20] : memref<2x1x96xf32, #tpu.memory_space<vmem>>, vector<1x1x96xf32>
    %32 = vector.shape_cast %31 : vector<1x1x96xf32> to vector<1x96xf32>
    %33 = vector.broadcast %32 : vector<1x96xf32> to vector<16x96xf32>
    %34 = arith.addf %30, %33 : vector<16x96xf32>
    %35 = vector.extract_strided_slice %1 {offsets = [0, 0, 0], sizes = [1, 8, 8], strides = [1, 1, 1]} : vector<2x8x8xf32> to vector<1x8x8xf32>
    %36 = vector.shape_cast %35 : vector<1x8x8xf32> to vector<8x8xf32>
    %37 = vector.extract_strided_slice %34 {offsets = [0, 0], sizes = [8, 16], strides = [1, 1]} : vector<16x96xf32> to vector<8x16xf32>
    %38 = vector.extract_strided_slice %34 {offsets = [0, 32], sizes = [8, 16], strides = [1, 1]} : vector<16x96xf32> to vector<8x16xf32>
    %39 = vector.extract_strided_slice %34 {offsets = [0, 64], sizes = [8, 16], strides = [1, 1]} : vector<16x96xf32> to vector<8x16xf32>
    %cst_21 = arith.constant dense<0.000000e+00> : vector<8x8xf32>
    %40 = tpu.matmul %37, %38, %cst_21 {dimension_numbers = #tpu.dot_dimension_numbers<[1], [1], [0], [0], [0, 0, 1, 0], [], []>} : vector<8x16xf32>, vector<8x16xf32>, vector<8x8xf32> -> vector<8x8xf32>
    %cst_22 = arith.constant 2.500000e-01 : f32
    %41 = vector.broadcast %cst_22 : f32 to vector<8x8xf32>
    %42 = arith.mulf %40, %41 : vector<8x8xf32>
    %43 = arith.addf %42, %36 : vector<8x8xf32>
    %cst_23 = arith.constant dense<0xFF800000> : vector<8xf32>
    %44 = vector.multi_reduction <maximumf>, %43, %cst_23 [1] : vector<8x8xf32> to vector<8xf32>
    %45 = vector.shape_cast %44 : vector<8xf32> to vector<8x1xf32>
    %46 = vector.broadcast %45 : vector<8x1xf32> to vector<8x8xf32>
    %47 = arith.subf %43, %46 : vector<8x8xf32>
    %48 = math.exp %47 : vector<8x8xf32>
    %cst_24 = arith.constant dense<0.000000e+00> : vector<8xf32>
    %49 = vector.multi_reduction <add>, %48, %cst_24 [1] : vector<8x8xf32> to vector<8xf32>
    %50 = vector.shape_cast %49 : vector<8xf32> to vector<8x1xf32>
    %51 = tpu.reciprocal %50 {approx = true} : vector<8x1xf32> -> vector<8x1xf32>
    %52 = vector.broadcast %51 : vector<8x1xf32> to vector<8x8xf32>
    %53 = arith.mulf %48, %52 : vector<8x8xf32>
    %cst_25 = arith.constant dense<0.000000e+00> : vector<8x16xf32>
    %54 = tpu.matmul %53, %39, %cst_25 {dimension_numbers = #tpu.dot_dimension_numbers<[1], [0], [0], [1], [0, 0, 1, 1], [], []>} : vector<8x8xf32>, vector<8x16xf32>, vector<8x16xf32> -> vector<8x16xf32>
    %c0_26 = arith.constant 0 : index
    %c0_27 = arith.constant 0 : index
    %55 = vector.load %arg19[%c0_26, %c0_27] : memref<16x32xf32, #tpu.memory_space<vmem>>, vector<8x16xf32>
    tpu.vector_store %arg19[%c0_26, %c0_27], %54 {strides = array<i32>} : memref<16x32xf32, #tpu.memory_space<vmem>>, vector<8x16xf32>,
    %56 = vector.extract_strided_slice %34 {offsets = [0, 16], sizes = [8, 16], strides = [1, 1]} : vector<16x96xf32> to vector<8x16xf32>
    %57 = vector.extract_strided_slice %34 {offsets = [0, 48], sizes = [8, 16], strides = [1, 1]} : vector<16x96xf32> to vector<8x16xf32>
    %58 = vector.extract_strided_slice %34 {offsets = [0, 80], sizes = [8, 16], strides = [1, 1]} : vector<16x96xf32> to vector<8x16xf32>
    %cst_28 = arith.constant dense<0.000000e+00> : vector<8x8xf32>
    %59 = tpu.matmul %56, %57, %cst_28 {dimension_numbers = #tpu.dot_dimension_numbers<[1], [1], [0], [0], [0, 0, 1, 0], [], []>} : vector<8x16xf32>, vector<8x16xf32>, vector<8x8xf32> -> vector<8x8xf32>
    %cst_29 = arith.constant 2.500000e-01 : f32
    %60 = vector.broadcast %cst_29 : f32 to vector<8x8xf32>
    %61 = arith.mulf %59, %60 : vector<8x8xf32>
    %62 = arith.addf %61, %36 : vector<8x8xf32>
    %cst_30 = arith.constant dense<0xFF800000> : vector<8xf32>
    %63 = vector.multi_reduction <maximumf>, %62, %cst_30 [1] : vector<8x8xf32> to vector<8xf32>
    %64 = vector.shape_cast %63 : vector<8xf32> to vector<8x1xf32>
    %65 = vector.broadcast %64 : vector<8x1xf32> to vector<8x8xf32>
    %66 = arith.subf %62, %65 : vector<8x8xf32>
    %67 = math.exp %66 : vector<8x8xf32>
    %cst_31 = arith.constant dense<0.000000e+00> : vector<8xf32>
    %68 = vector.multi_reduction <add>, %67, %cst_31 [1] : vector<8x8xf32> to vector<8xf32>
    %69 = vector.shape_cast %68 : vector<8xf32> to vector<8x1xf32>
    %70 = tpu.reciprocal %69 {approx = true} : vector<8x1xf32> -> vector<8x1xf32>
    %71 = vector.broadcast %70 : vector<8x1xf32> to vector<8x8xf32>
    %72 = arith.mulf %67, %71 : vector<8x8xf32>
    %cst_32 = arith.constant dense<0.000000e+00> : vector<8x16xf32>
    %73 = tpu.matmul %72, %58, %cst_32 {dimension_numbers = #tpu.dot_dimension_numbers<[1], [0], [0], [1], [0, 0, 1, 1], [], []>} : vector<8x8xf32>, vector<8x16xf32>, vector<8x16xf32> -> vector<8x16xf32>
    %c0_33 = arith.constant 0 : index
    %c16 = arith.constant 16 : index
    %74 = vector.load %arg19[%c0_33, %c16] : memref<16x32xf32, #tpu.memory_space<vmem>>, vector<8x16xf32>
    tpu.vector_store %arg19[%c0_33, %c16], %73 {strides = array<i32>} : memref<16x32xf32, #tpu.memory_space<vmem>>, vector<8x16xf32>,
    %75 = vector.extract_strided_slice %1 {offsets = [1, 0, 0], sizes = [1, 8, 8], strides = [1, 1, 1]} : vector<2x8x8xf32> to vector<1x8x8xf32>
    %76 = vector.shape_cast %75 : vector<1x8x8xf32> to vector<8x8xf32>
    %77 = vector.extract_strided_slice %34 {offsets = [8, 0], sizes = [8, 16], strides = [1, 1]} : vector<16x96xf32> to vector<8x16xf32>
    %78 = vector.extract_strided_slice %34 {offsets = [8, 32], sizes = [8, 16], strides = [1, 1]} : vector<16x96xf32> to vector<8x16xf32>
    %79 = vector.extract_strided_slice %34 {offsets = [8, 64], sizes = [8, 16], strides = [1, 1]} : vector<16x96xf32> to vector<8x16xf32>
    %cst_34 = arith.constant dense<0.000000e+00> : vector<8x8xf32>
    %80 = tpu.matmul %77, %78, %cst_34 {dimension_numbers = #tpu.dot_dimension_numbers<[1], [1], [0], [0], [0, 0, 1, 0], [], []>} : vector<8x16xf32>, vector<8x16xf32>, vector<8x8xf32> -> vector<8x8xf32>
    %cst_35 = arith.constant 2.500000e-01 : f32
    %81 = vector.broadcast %cst_35 : f32 to vector<8x8xf32>
    %82 = arith.mulf %80, %81 : vector<8x8xf32>
    %83 = arith.addf %82, %76 : vector<8x8xf32>
    %cst_36 = arith.constant dense<0xFF800000> : vector<8xf32>
    %84 = vector.multi_reduction <maximumf>, %83, %cst_36 [1] : vector<8x8xf32> to vector<8xf32>
    %85 = vector.shape_cast %84 : vector<8xf32> to vector<8x1xf32>
    %86 = vector.broadcast %85 : vector<8x1xf32> to vector<8x8xf32>
    %87 = arith.subf %83, %86 : vector<8x8xf32>
    %88 = math.exp %87 : vector<8x8xf32>
    %cst_37 = arith.constant dense<0.000000e+00> : vector<8xf32>
    %89 = vector.multi_reduction <add>, %88, %cst_37 [1] : vector<8x8xf32> to vector<8xf32>
    %90 = vector.shape_cast %89 : vector<8xf32> to vector<8x1xf32>
    %91 = tpu.reciprocal %90 {approx = true} : vector<8x1xf32> -> vector<8x1xf32>
    %92 = vector.broadcast %91 : vector<8x1xf32> to vector<8x8xf32>
    %93 = arith.mulf %88, %92 : vector<8x8xf32>
    %cst_38 = arith.constant dense<0.000000e+00> : vector<8x16xf32>
    %94 = tpu.matmul %93, %79, %cst_38 {dimension_numbers = #tpu.dot_dimension_numbers<[1], [0], [0], [1], [0, 0, 1, 1], [], []>} : vector<8x8xf32>, vector<8x16xf32>, vector<8x16xf32> -> vector<8x16xf32>
    %c8 = arith.constant 8 : index
    %c0_39 = arith.constant 0 : index
    %95 = vector.load %arg19[%c8, %c0_39] : memref<16x32xf32, #tpu.memory_space<vmem>>, vector<8x16xf32>
    tpu.vector_store %arg19[%c8, %c0_39], %94 {strides = array<i32>} : memref<16x32xf32, #tpu.memory_space<vmem>>, vector<8x16xf32>,
    %96 = vector.extract_strided_slice %34 {offsets = [8, 16], sizes = [8, 16], strides = [1, 1]} : vector<16x96xf32> to vector<8x16xf32>
    %97 = vector.extract_strided_slice %34 {offsets = [8, 48], sizes = [8, 16], strides = [1, 1]} : vector<16x96xf32> to vector<8x16xf32>
    %98 = vector.extract_strided_slice %34 {offsets = [8, 80], sizes = [8, 16], strides = [1, 1]} : vector<16x96xf32> to vector<8x16xf32>
    %cst_40 = arith.constant dense<0.000000e+00> : vector<8x8xf32>
    %99 = tpu.matmul %96, %97, %cst_40 {dimension_numbers = #tpu.dot_dimension_numbers<[1], [1], [0], [0], [0, 0, 1, 0], [], []>} : vector<8x16xf32>, vector<8x16xf32>, vector<8x8xf32> -> vector<8x8xf32>
    %cst_41 = arith.constant 2.500000e-01 : f32
    %100 = vector.broadcast %cst_41 : f32 to vector<8x8xf32>
    %101 = arith.mulf %99, %100 : vector<8x8xf32>
    %102 = arith.addf %101, %76 : vector<8x8xf32>
    %cst_42 = arith.constant dense<0xFF800000> : vector<8xf32>
    %103 = vector.multi_reduction <maximumf>, %102, %cst_42 [1] : vector<8x8xf32> to vector<8xf32>
    %104 = vector.shape_cast %103 : vector<8xf32> to vector<8x1xf32>
    %105 = vector.broadcast %104 : vector<8x1xf32> to vector<8x8xf32>
    %106 = arith.subf %102, %105 : vector<8x8xf32>
    %107 = math.exp %106 : vector<8x8xf32>
    %cst_43 = arith.constant dense<0.000000e+00> : vector<8xf32>
    %108 = vector.multi_reduction <add>, %107, %cst_43 [1] : vector<8x8xf32> to vector<8xf32>
    %109 = vector.shape_cast %108 : vector<8xf32> to vector<8x1xf32>
    %110 = tpu.reciprocal %109 {approx = true} : vector<8x1xf32> -> vector<8x1xf32>
    %111 = vector.broadcast %110 : vector<8x1xf32> to vector<8x8xf32>
    %112 = arith.mulf %107, %111 : vector<8x8xf32>
    %cst_44 = arith.constant dense<0.000000e+00> : vector<8x16xf32>
    %113 = tpu.matmul %112, %98, %cst_44 {dimension_numbers = #tpu.dot_dimension_numbers<[1], [0], [0], [1], [0, 0, 1, 1], [], []>} : vector<8x8xf32>, vector<8x16xf32>, vector<8x16xf32> -> vector<8x16xf32>
    %c8_45 = arith.constant 8 : index
    %c16_46 = arith.constant 16 : index
    %114 = vector.load %arg19[%c8_45, %c16_46] : memref<16x32xf32, #tpu.memory_space<vmem>>, vector<8x16xf32>
    tpu.vector_store %arg19[%c8_45, %c16_46], %113 {strides = array<i32>} : memref<16x32xf32, #tpu.memory_space<vmem>>, vector<8x16xf32>,
    %c0_47 = arith.constant 0 : index
    %c0_48 = arith.constant 0 : index
    %115 = vector.load %arg19[%c0_47, %c0_48] : memref<16x32xf32, #tpu.memory_space<vmem>>, vector<16x32xf32>
    %c0_49 = arith.constant 0 : index
    %c0_50 = arith.constant 0 : index
    %c0_51 = arith.constant 0 : index
    %116 = vector.load %arg6[%c0_49, %c0_50, %c0_51] : memref<2x32x32xf32, #tpu.memory_space<vmem>>, vector<1x32x32xf32>
    %117 = vector.shape_cast %116 : vector<1x32x32xf32> to vector<32x32xf32>
    %cst_52 = arith.constant dense<0.000000e+00> : vector<16x32xf32>
    %118 = tpu.matmul %115, %117, %cst_52 {dimension_numbers = #tpu.dot_dimension_numbers<[1], [0], [0], [1], [0, 0, 1, 1], [], []>} : vector<16x32xf32>, vector<32x32xf32>, vector<16x32xf32> -> vector<16x32xf32>
    %c0_53 = arith.constant 0 : index
    %c0_54 = arith.constant 0 : index
    %c0_55 = arith.constant 0 : index
    %119 = vector.load %arg7[%c0_53, %c0_54, %c0_55] : memref<2x1x32xf32, #tpu.memory_space<vmem>>, vector<1x1x32xf32>
    %120 = vector.shape_cast %119 : vector<1x1x32xf32> to vector<1x32xf32>
    %121 = vector.broadcast %120 : vector<1x32xf32> to vector<16x32xf32>
    %122 = arith.addf %118, %121 : vector<16x32xf32>
    %123 = arith.addf %0, %122 : vector<16x32xf32>
    %c0_56 = arith.constant 0 : index
    %c0_57 = arith.constant 0 : index
    %c0_58 = arith.constant 0 : index
    %124 = vector.load %arg8[%c0_56, %c0_57, %c0_58] : memref<2x1x32xf32, #tpu.memory_space<vmem>>, vector<1x1x32xf32>
    %125 = vector.shape_cast %124 : vector<1x1x32xf32> to vector<1x32xf32>
    %c0_59 = arith.constant 0 : index
    %c0_60 = arith.constant 0 : index
    %c0_61 = arith.constant 0 : index
    %126 = vector.load %arg9[%c0_59, %c0_60, %c0_61] : memref<2x1x32xf32, #tpu.memory_space<vmem>>, vector<1x1x32xf32>
    %127 = vector.shape_cast %126 : vector<1x1x32xf32> to vector<1x32xf32>
    %cst_62 = arith.constant dense<0.000000e+00> : vector<16xf32>
    %128 = vector.multi_reduction <add>, %123, %cst_62 [1] : vector<16x32xf32> to vector<16xf32>
    %129 = vector.shape_cast %128 : vector<16xf32> to vector<16x1xf32>
    %cst_63 = arith.constant 3.200000e+01 : f32
    %130 = vector.broadcast %cst_63 : f32 to vector<16x1xf32>
    %131 = arith.divf %129, %130 : vector<16x1xf32>
    %132 = vector.broadcast %131 : vector<16x1xf32> to vector<16x32xf32>
    %133 = arith.subf %123, %132 : vector<16x32xf32>
    %134 = arith.mulf %133, %133 : vector<16x32xf32>
    %cst_64 = arith.constant dense<0.000000e+00> : vector<16xf32>
    %135 = vector.multi_reduction <add>, %134, %cst_64 [1] : vector<16x32xf32> to vector<16xf32>
    %136 = vector.shape_cast %135 : vector<16xf32> to vector<16x1xf32>
    %cst_65 = arith.constant 3.200000e+01 : f32
    %137 = vector.broadcast %cst_65 : f32 to vector<16x1xf32>
    %138 = arith.divf %136, %137 : vector<16x1xf32>
    %139 = vector.broadcast %131 : vector<16x1xf32> to vector<16x32xf32>
    %140 = arith.subf %123, %139 : vector<16x32xf32>
    %cst_66 = arith.constant 9.99999974E-6 : f32
    %141 = vector.broadcast %cst_66 : f32 to vector<16x1xf32>
    %142 = arith.addf %138, %141 : vector<16x1xf32>
    %143 = math.rsqrt %142 : vector<16x1xf32>
    %144 = vector.broadcast %143 : vector<16x1xf32> to vector<16x32xf32>
    %145 = arith.mulf %140, %144 : vector<16x32xf32>
    %146 = vector.broadcast %125 : vector<1x32xf32> to vector<16x32xf32>
    %147 = arith.mulf %145, %146 : vector<16x32xf32>
    %148 = vector.broadcast %127 : vector<1x32xf32> to vector<16x32xf32>
    %149 = arith.addf %147, %148 : vector<16x32xf32>
    %c0_67 = arith.constant 0 : index
    %c0_68 = arith.constant 0 : index
    %c0_69 = arith.constant 0 : index
    %150 = vector.load %arg10[%c0_67, %c0_68, %c0_69] : memref<2x32x128xf32, #tpu.memory_space<vmem>>, vector<1x32x128xf32>
    %151 = vector.shape_cast %150 : vector<1x32x128xf32> to vector<32x128xf32>
    %cst_70 = arith.constant dense<0.000000e+00> : vector<16x128xf32>
    %152 = tpu.matmul %149, %151, %cst_70 {dimension_numbers = #tpu.dot_dimension_numbers<[1], [0], [0], [1], [0, 0, 1, 1], [], []>} : vector<16x32xf32>, vector<32x128xf32>, vector<16x128xf32> -> vector<16x128xf32>
    %c0_71 = arith.constant 0 : index
    %c0_72 = arith.constant 0 : index
    %c0_73 = arith.constant 0 : index
    %153 = vector.load %arg11[%c0_71, %c0_72, %c0_73] : memref<2x1x128xf32, #tpu.memory_space<vmem>>, vector<1x1x128xf32>
    %154 = vector.shape_cast %153 : vector<1x1x128xf32> to vector<1x128xf32>
    %155 = vector.broadcast %154 : vector<1x128xf32> to vector<16x128xf32>
    %156 = arith.addf %152, %155 : vector<16x128xf32>
    %cst_74 = arith.constant 5.000000e-01 : f32
    %157 = vector.broadcast %cst_74 : f32 to vector<16x128xf32>
    %158 = arith.mulf %157, %156 : vector<16x128xf32>
    %cst_75 = arith.constant 4.471500e-02 : f32
    %159 = vector.broadcast %cst_75 : f32 to vector<16x128xf32>
    %160 = arith.mulf %159, %156 : vector<16x128xf32>
    %161 = arith.mulf %160, %156 : vector<16x128xf32>
    %162 = arith.mulf %161, %156 : vector<16x128xf32>
    %163 = arith.addf %156, %162 : vector<16x128xf32>
    %cst_76 = arith.constant 0.797884583 : f32
    %164 = vector.broadcast %cst_76 : f32 to vector<16x128xf32>
    %165 = arith.mulf %164, %163 : vector<16x128xf32>
    %166 = math.tanh %165 : vector<16x128xf32>
    %cst_77 = arith.constant 1.000000e+00 : f32
    %167 = vector.broadcast %cst_77 : f32 to vector<16x128xf32>
    %168 = arith.addf %167, %166 : vector<16x128xf32>
    %169 = arith.mulf %158, %168 : vector<16x128xf32>
    %c0_78 = arith.constant 0 : index
    %c0_79 = arith.constant 0 : index
    %c0_80 = arith.constant 0 : index
    %170 = vector.load %arg12[%c0_78, %c0_79, %c0_80] : memref<2x128x32xf32, #tpu.memory_space<vmem>>, vector<1x128x32xf32>
    %171 = vector.shape_cast %170 : vector<1x128x32xf32> to vector<128x32xf32>
    %cst_81 = arith.constant dense<0.000000e+00> : vector<16x32xf32>
    %172 = tpu.matmul %169, %171, %cst_81 {dimension_numbers = #tpu.dot_dimension_numbers<[1], [0], [0], [1], [0, 0, 1, 1], [], []>} : vector<16x128xf32>, vector<128x32xf32>, vector<16x32xf32> -> vector<16x32xf32>
    %173 = arith.addf %123, %172 : vector<16x32xf32>
    %c0_82 = arith.constant 0 : index
    %c0_83 = arith.constant 0 : index
    %c0_84 = arith.constant 0 : index
    %174 = vector.load %arg13[%c0_82, %c0_83, %c0_84] : memref<2x1x32xf32, #tpu.memory_space<vmem>>, vector<1x1x32xf32>
    %175 = vector.shape_cast %174 : vector<1x1x32xf32> to vector<1x32xf32>
    %176 = vector.broadcast %175 : vector<1x32xf32> to vector<16x32xf32>
    %177 = arith.addf %173, %176 : vector<16x32xf32>
    %c1 = arith.constant 1 : index
    %c0_85 = arith.constant 0 : index
    %c0_86 = arith.constant 0 : index
    %178 = vector.load %arg2[%c1, %c0_85, %c0_86] : memref<2x1x32xf32, #tpu.memory_space<vmem>>, vector<1x1x32xf32>
    %179 = vector.shape_cast %178 : vector<1x1x32xf32> to vector<1x32xf32>
    %c1_87 = arith.constant 1 : index
    %c0_88 = arith.constant 0 : index
    %c0_89 = arith.constant 0 : index
    %180 = vector.load %arg3[%c1_87, %c0_88, %c0_89] : memref<2x1x32xf32, #tpu.memory_space<vmem>>, vector<1x1x32xf32>
    %181 = vector.shape_cast %180 : vector<1x1x32xf32> to vector<1x32xf32>
    %cst_90 = arith.constant dense<0.000000e+00> : vector<16xf32>
    %182 = vector.multi_reduction <add>, %177, %cst_90 [1] : vector<16x32xf32> to vector<16xf32>
    %183 = vector.shape_cast %182 : vector<16xf32> to vector<16x1xf32>
    %cst_91 = arith.constant 3.200000e+01 : f32
    %184 = vector.broadcast %cst_91 : f32 to vector<16x1xf32>
    %185 = arith.divf %183, %184 : vector<16x1xf32>
    %186 = vector.broadcast %185 : vector<16x1xf32> to vector<16x32xf32>
    %187 = arith.subf %177, %186 : vector<16x32xf32>
    %188 = arith.mulf %187, %187 : vector<16x32xf32>
    %cst_92 = arith.constant dense<0.000000e+00> : vector<16xf32>
    %189 = vector.multi_reduction <add>, %188, %cst_92 [1] : vector<16x32xf32> to vector<16xf32>
    %190 = vector.shape_cast %189 : vector<16xf32> to vector<16x1xf32>
    %cst_93 = arith.constant 3.200000e+01 : f32
    %191 = vector.broadcast %cst_93 : f32 to vector<16x1xf32>
    %192 = arith.divf %190, %191 : vector<16x1xf32>
    %193 = vector.broadcast %185 : vector<16x1xf32> to vector<16x32xf32>
    %194 = arith.subf %177, %193 : vector<16x32xf32>
    %cst_94 = arith.constant 9.99999974E-6 : f32
    %195 = vector.broadcast %cst_94 : f32 to vector<16x1xf32>
    %196 = arith.addf %192, %195 : vector<16x1xf32>
    %197 = math.rsqrt %196 : vector<16x1xf32>
    %198 = vector.broadcast %197 : vector<16x1xf32> to vector<16x32xf32>
    %199 = arith.mulf %194, %198 : vector<16x32xf32>
    %200 = vector.broadcast %179 : vector<1x32xf32> to vector<16x32xf32>
    %201 = arith.mulf %199, %200 : vector<16x32xf32>
    %202 = vector.broadcast %181 : vector<1x32xf32> to vector<16x32xf32>
    %203 = arith.addf %201, %202 : vector<16x32xf32>
    %c1_95 = arith.constant 1 : index
    %c0_96 = arith.constant 0 : index
    %c0_97 = arith.constant 0 : index
    %204 = vector.load %arg4[%c1_95, %c0_96, %c0_97] : memref<2x32x96xf32, #tpu.memory_space<vmem>>, vector<1x32x96xf32>
    %205 = vector.shape_cast %204 : vector<1x32x96xf32> to vector<32x96xf32>
    %cst_98 = arith.constant dense<0.000000e+00> : vector<16x96xf32>
    %206 = tpu.matmul %203, %205, %cst_98 {dimension_numbers = #tpu.dot_dimension_numbers<[1], [0], [0], [1], [0, 0, 1, 1], [], []>} : vector<16x32xf32>, vector<32x96xf32>, vector<16x96xf32> -> vector<16x96xf32>
    %c1_99 = arith.constant 1 : index
    %c0_100 = arith.constant 0 : index
    %c0_101 = arith.constant 0 : index
    %207 = vector.load %arg5[%c1_99, %c0_100, %c0_101] : memref<2x1x96xf32, #tpu.memory_space<vmem>>, vector<1x1x96xf32>
    %208 = vector.shape_cast %207 : vector<1x1x96xf32> to vector<1x96xf32>
    %209 = vector.broadcast %208 : vector<1x96xf32> to vector<16x96xf32>
    %210 = arith.addf %206, %209 : vector<16x96xf32>
    %211 = vector.extract_strided_slice %1 {offsets = [0, 0, 0], sizes = [1, 8, 8], strides = [1, 1, 1]} : vector<2x8x8xf32> to vector<1x8x8xf32>
    %212 = vector.shape_cast %211 : vector<1x8x8xf32> to vector<8x8xf32>
    %213 = vector.extract_strided_slice %210 {offsets = [0, 0], sizes = [8, 16], strides = [1, 1]} : vector<16x96xf32> to vector<8x16xf32>
    %214 = vector.extract_strided_slice %210 {offsets = [0, 32], sizes = [8, 16], strides = [1, 1]} : vector<16x96xf32> to vector<8x16xf32>
    %215 = vector.extract_strided_slice %210 {offsets = [0, 64], sizes = [8, 16], strides = [1, 1]} : vector<16x96xf32> to vector<8x16xf32>
    %cst_102 = arith.constant dense<0.000000e+00> : vector<8x8xf32>
    %216 = tpu.matmul %213, %214, %cst_102 {dimension_numbers = #tpu.dot_dimension_numbers<[1], [1], [0], [0], [0, 0, 1, 0], [], []>} : vector<8x16xf32>, vector<8x16xf32>, vector<8x8xf32> -> vector<8x8xf32>
    %cst_103 = arith.constant 2.500000e-01 : f32
    %217 = vector.broadcast %cst_103 : f32 to vector<8x8xf32>
    %218 = arith.mulf %216, %217 : vector<8x8xf32>
    %219 = arith.addf %218, %212 : vector<8x8xf32>
    %cst_104 = arith.constant dense<0xFF800000> : vector<8xf32>
    %220 = vector.multi_reduction <maximumf>, %219, %cst_104 [1] : vector<8x8xf32> to vector<8xf32>
    %221 = vector.shape_cast %220 : vector<8xf32> to vector<8x1xf32>
    %222 = vector.broadcast %221 : vector<8x1xf32> to vector<8x8xf32>
    %223 = arith.subf %219, %222 : vector<8x8xf32>
    %224 = math.exp %223 : vector<8x8xf32>
    %cst_105 = arith.constant dense<0.000000e+00> : vector<8xf32>
    %225 = vector.multi_reduction <add>, %224, %cst_105 [1] : vector<8x8xf32> to vector<8xf32>
    %226 = vector.shape_cast %225 : vector<8xf32> to vector<8x1xf32>
    %227 = tpu.reciprocal %226 {approx = true} : vector<8x1xf32> -> vector<8x1xf32>
    %228 = vector.broadcast %227 : vector<8x1xf32> to vector<8x8xf32>
    %229 = arith.mulf %224, %228 : vector<8x8xf32>
    %cst_106 = arith.constant dense<0.000000e+00> : vector<8x16xf32>
    %230 = tpu.matmul %229, %215, %cst_106 {dimension_numbers = #tpu.dot_dimension_numbers<[1], [0], [0], [1], [0, 0, 1, 1], [], []>} : vector<8x8xf32>, vector<8x16xf32>, vector<8x16xf32> -> vector<8x16xf32>
    %c0_107 = arith.constant 0 : index
    %c0_108 = arith.constant 0 : index
    %231 = vector.load %arg19[%c0_107, %c0_108] : memref<16x32xf32, #tpu.memory_space<vmem>>, vector<8x16xf32>
    tpu.vector_store %arg19[%c0_107, %c0_108], %230 {strides = array<i32>} : memref<16x32xf32, #tpu.memory_space<vmem>>, vector<8x16xf32>,
    %232 = vector.extract_strided_slice %210 {offsets = [0, 16], sizes = [8, 16], strides = [1, 1]} : vector<16x96xf32> to vector<8x16xf32>
    %233 = vector.extract_strided_slice %210 {offsets = [0, 48], sizes = [8, 16], strides = [1, 1]} : vector<16x96xf32> to vector<8x16xf32>
    %234 = vector.extract_strided_slice %210 {offsets = [0, 80], sizes = [8, 16], strides = [1, 1]} : vector<16x96xf32> to vector<8x16xf32>
    %cst_109 = arith.constant dense<0.000000e+00> : vector<8x8xf32>
    %235 = tpu.matmul %232, %233, %cst_109 {dimension_numbers = #tpu.dot_dimension_numbers<[1], [1], [0], [0], [0, 0, 1, 0], [], []>} : vector<8x16xf32>, vector<8x16xf32>, vector<8x8xf32> -> vector<8x8xf32>
    %cst_110 = arith.constant 2.500000e-01 : f32
    %236 = vector.broadcast %cst_110 : f32 to vector<8x8xf32>
    %237 = arith.mulf %235, %236 : vector<8x8xf32>
    %238 = arith.addf %237, %212 : vector<8x8xf32>
    %cst_111 = arith.constant dense<0xFF800000> : vector<8xf32>
    %239 = vector.multi_reduction <maximumf>, %238, %cst_111 [1] : vector<8x8xf32> to vector<8xf32>
    %240 = vector.shape_cast %239 : vector<8xf32> to vector<8x1xf32>
    %241 = vector.broadcast %240 : vector<8x1xf32> to vector<8x8xf32>
    %242 = arith.subf %238, %241 : vector<8x8xf32>
    %243 = math.exp %242 : vector<8x8xf32>
    %cst_112 = arith.constant dense<0.000000e+00> : vector<8xf32>
    %244 = vector.multi_reduction <add>, %243, %cst_112 [1] : vector<8x8xf32> to vector<8xf32>
    %245 = vector.shape_cast %244 : vector<8xf32> to vector<8x1xf32>
    %246 = tpu.reciprocal %245 {approx = true} : vector<8x1xf32> -> vector<8x1xf32>
    %247 = vector.broadcast %246 : vector<8x1xf32> to vector<8x8xf32>
    %248 = arith.mulf %243, %247 : vector<8x8xf32>
    %cst_113 = arith.constant dense<0.000000e+00> : vector<8x16xf32>
    %249 = tpu.matmul %248, %234, %cst_113 {dimension_numbers = #tpu.dot_dimension_numbers<[1], [0], [0], [1], [0, 0, 1, 1], [], []>} : vector<8x8xf32>, vector<8x16xf32>, vector<8x16xf32> -> vector<8x16xf32>
    %c0_114 = arith.constant 0 : index
    %c16_115 = arith.constant 16 : index
    %250 = vector.load %arg19[%c0_114, %c16_115] : memref<16x32xf32, #tpu.memory_space<vmem>>, vector<8x16xf32>
    tpu.vector_store %arg19[%c0_114, %c16_115], %249 {strides = array<i32>} : memref<16x32xf32, #tpu.memory_space<vmem>>, vector<8x16xf32>,
    %251 = vector.extract_strided_slice %1 {offsets = [1, 0, 0], sizes = [1, 8, 8], strides = [1, 1, 1]} : vector<2x8x8xf32> to vector<1x8x8xf32>
    %252 = vector.shape_cast %251 : vector<1x8x8xf32> to vector<8x8xf32>
    %253 = vector.extract_strided_slice %210 {offsets = [8, 0], sizes = [8, 16], strides = [1, 1]} : vector<16x96xf32> to vector<8x16xf32>
    %254 = vector.extract_strided_slice %210 {offsets = [8, 32], sizes = [8, 16], strides = [1, 1]} : vector<16x96xf32> to vector<8x16xf32>
    %255 = vector.extract_strided_slice %210 {offsets = [8, 64], sizes = [8, 16], strides = [1, 1]} : vector<16x96xf32> to vector<8x16xf32>
    %cst_116 = arith.constant dense<0.000000e+00> : vector<8x8xf32>
    %256 = tpu.matmul %253, %254, %cst_116 {dimension_numbers = #tpu.dot_dimension_numbers<[1], [1], [0], [0], [0, 0, 1, 0], [], []>} : vector<8x16xf32>, vector<8x16xf32>, vector<8x8xf32> -> vector<8x8xf32>
    %cst_117 = arith.constant 2.500000e-01 : f32
    %257 = vector.broadcast %cst_117 : f32 to vector<8x8xf32>
    %258 = arith.mulf %256, %257 : vector<8x8xf32>
    %259 = arith.addf %258, %252 : vector<8x8xf32>
    %cst_118 = arith.constant dense<0xFF800000> : vector<8xf32>
    %260 = vector.multi_reduction <maximumf>, %259, %cst_118 [1] : vector<8x8xf32> to vector<8xf32>
    %261 = vector.shape_cast %260 : vector<8xf32> to vector<8x1xf32>
    %262 = vector.broadcast %261 : vector<8x1xf32> to vector<8x8xf32>
    %263 = arith.subf %259, %262 : vector<8x8xf32>
    %264 = math.exp %263 : vector<8x8xf32>
    %cst_119 = arith.constant dense<0.000000e+00> : vector<8xf32>
    %265 = vector.multi_reduction <add>, %264, %cst_119 [1] : vector<8x8xf32> to vector<8xf32>
    %266 = vector.shape_cast %265 : vector<8xf32> to vector<8x1xf32>
    %267 = tpu.reciprocal %266 {approx = true} : vector<8x1xf32> -> vector<8x1xf32>
    %268 = vector.broadcast %267 : vector<8x1xf32> to vector<8x8xf32>
    %269 = arith.mulf %264, %268 : vector<8x8xf32>
    %cst_120 = arith.constant dense<0.000000e+00> : vector<8x16xf32>
    %270 = tpu.matmul %269, %255, %cst_120 {dimension_numbers = #tpu.dot_dimension_numbers<[1], [0], [0], [1], [0, 0, 1, 1], [], []>} : vector<8x8xf32>, vector<8x16xf32>, vector<8x16xf32> -> vector<8x16xf32>
    %c8_121 = arith.constant 8 : index
    %c0_122 = arith.constant 0 : index
    %271 = vector.load %arg19[%c8_121, %c0_122] : memref<16x32xf32, #tpu.memory_space<vmem>>, vector<8x16xf32>
    tpu.vector_store %arg19[%c8_121, %c0_122], %270 {strides = array<i32>} : memref<16x32xf32, #tpu.memory_space<vmem>>, vector<8x16xf32>,
    %272 = vector.extract_strided_slice %210 {offsets = [8, 16], sizes = [8, 16], strides = [1, 1]} : vector<16x96xf32> to vector<8x16xf32>
    %273 = vector.extract_strided_slice %210 {offsets = [8, 48], sizes = [8, 16], strides = [1, 1]} : vector<16x96xf32> to vector<8x16xf32>
    %274 = vector.extract_strided_slice %210 {offsets = [8, 80], sizes = [8, 16], strides = [1, 1]} : vector<16x96xf32> to vector<8x16xf32>
    %cst_123 = arith.constant dense<0.000000e+00> : vector<8x8xf32>
    %275 = tpu.matmul %272, %273, %cst_123 {dimension_numbers = #tpu.dot_dimension_numbers<[1], [1], [0], [0], [0, 0, 1, 0], [], []>} : vector<8x16xf32>, vector<8x16xf32>, vector<8x8xf32> -> vector<8x8xf32>
    %cst_124 = arith.constant 2.500000e-01 : f32
    %276 = vector.broadcast %cst_124 : f32 to vector<8x8xf32>
    %277 = arith.mulf %275, %276 : vector<8x8xf32>
    %278 = arith.addf %277, %252 : vector<8x8xf32>
    %cst_125 = arith.constant dense<0xFF800000> : vector<8xf32>
    %279 = vector.multi_reduction <maximumf>, %278, %cst_125 [1] : vector<8x8xf32> to vector<8xf32>
    %280 = vector.shape_cast %279 : vector<8xf32> to vector<8x1xf32>
    %281 = vector.broadcast %280 : vector<8x1xf32> to vector<8x8xf32>
    %282 = arith.subf %278, %281 : vector<8x8xf32>
    %283 = math.exp %282 : vector<8x8xf32>
    %cst_126 = arith.constant dense<0.000000e+00> : vector<8xf32>
    %284 = vector.multi_reduction <add>, %283, %cst_126 [1] : vector<8x8xf32> to vector<8xf32>
    %285 = vector.shape_cast %284 : vector<8xf32> to vector<8x1xf32>
    %286 = tpu.reciprocal %285 {approx = true} : vector<8x1xf32> -> vector<8x1xf32>
    %287 = vector.broadcast %286 : vector<8x1xf32> to vector<8x8xf32>
    %288 = arith.mulf %283, %287 : vector<8x8xf32>
    %cst_127 = arith.constant dense<0.000000e+00> : vector<8x16xf32>
    %289 = tpu.matmul %288, %274, %cst_127 {dimension_numbers = #tpu.dot_dimension_numbers<[1], [0], [0], [1], [0, 0, 1, 1], [], []>} : vector<8x8xf32>, vector<8x16xf32>, vector<8x16xf32> -> vector<8x16xf32>
    %c8_128 = arith.constant 8 : index
    %c16_129 = arith.constant 16 : index
    %290 = vector.load %arg19[%c8_128, %c16_129] : memref<16x32xf32, #tpu.memory_space<vmem>>, vector<8x16xf32>
    tpu.vector_store %arg19[%c8_128, %c16_129], %289 {strides = array<i32>} : memref<16x32xf32, #tpu.memory_space<vmem>>, vector<8x16xf32>,
    %c0_130 = arith.constant 0 : index
    %c0_131 = arith.constant 0 : index
    %291 = vector.load %arg19[%c0_130, %c0_131] : memref<16x32xf32, #tpu.memory_space<vmem>>, vector<16x32xf32>
    %c1_132 = arith.constant 1 : index
    %c0_133 = arith.constant 0 : index
    %c0_134 = arith.constant 0 : index
    %292 = vector.load %arg6[%c1_132, %c0_133, %c0_134] : memref<2x32x32xf32, #tpu.memory_space<vmem>>, vector<1x32x32xf32>
    %293 = vector.shape_cast %292 : vector<1x32x32xf32> to vector<32x32xf32>
    %cst_135 = arith.constant dense<0.000000e+00> : vector<16x32xf32>
    %294 = tpu.matmul %291, %293, %cst_135 {dimension_numbers = #tpu.dot_dimension_numbers<[1], [0], [0], [1], [0, 0, 1, 1], [], []>} : vector<16x32xf32>, vector<32x32xf32>, vector<16x32xf32> -> vector<16x32xf32>
    %c1_136 = arith.constant 1 : index
    %c0_137 = arith.constant 0 : index
    %c0_138 = arith.constant 0 : index
    %295 = vector.load %arg7[%c1_136, %c0_137, %c0_138] : memref<2x1x32xf32, #tpu.memory_space<vmem>>, vector<1x1x32xf32>
    %296 = vector.shape_cast %295 : vector<1x1x32xf32> to vector<1x32xf32>
    %297 = vector.broadcast %296 : vector<1x32xf32> to vector<16x32xf32>
    %298 = arith.addf %294, %297 : vector<16x32xf32>
    %299 = arith.addf %177, %298 : vector<16x32xf32>
    %c1_139 = arith.constant 1 : index
    %c0_140 = arith.constant 0 : index
    %c0_141 = arith.constant 0 : index
    %300 = vector.load %arg8[%c1_139, %c0_140, %c0_141] : memref<2x1x32xf32, #tpu.memory_space<vmem>>, vector<1x1x32xf32>
    %301 = vector.shape_cast %300 : vector<1x1x32xf32> to vector<1x32xf32>
    %c1_142 = arith.constant 1 : index
    %c0_143 = arith.constant 0 : index
    %c0_144 = arith.constant 0 : index
    %302 = vector.load %arg9[%c1_142, %c0_143, %c0_144] : memref<2x1x32xf32, #tpu.memory_space<vmem>>, vector<1x1x32xf32>
    %303 = vector.shape_cast %302 : vector<1x1x32xf32> to vector<1x32xf32>
    %cst_145 = arith.constant dense<0.000000e+00> : vector<16xf32>
    %304 = vector.multi_reduction <add>, %299, %cst_145 [1] : vector<16x32xf32> to vector<16xf32>
    %305 = vector.shape_cast %304 : vector<16xf32> to vector<16x1xf32>
    %cst_146 = arith.constant 3.200000e+01 : f32
    %306 = vector.broadcast %cst_146 : f32 to vector<16x1xf32>
    %307 = arith.divf %305, %306 : vector<16x1xf32>
    %308 = vector.broadcast %307 : vector<16x1xf32> to vector<16x32xf32>
    %309 = arith.subf %299, %308 : vector<16x32xf32>
    %310 = arith.mulf %309, %309 : vector<16x32xf32>
    %cst_147 = arith.constant dense<0.000000e+00> : vector<16xf32>
    %311 = vector.multi_reduction <add>, %310, %cst_147 [1] : vector<16x32xf32> to vector<16xf32>
    %312 = vector.shape_cast %311 : vector<16xf32> to vector<16x1xf32>
    %cst_148 = arith.constant 3.200000e+01 : f32
    %313 = vector.broadcast %cst_148 : f32 to vector<16x1xf32>
    %314 = arith.divf %312, %313 : vector<16x1xf32>
    %315 = vector.broadcast %307 : vector<16x1xf32> to vector<16x32xf32>
    %316 = arith.subf %299, %315 : vector<16x32xf32>
    %cst_149 = arith.constant 9.99999974E-6 : f32
    %317 = vector.broadcast %cst_149 : f32 to vector<16x1xf32>
    %318 = arith.addf %314, %317 : vector<16x1xf32>
    %319 = math.rsqrt %318 : vector<16x1xf32>
    %320 = vector.broadcast %319 : vector<16x1xf32> to vector<16x32xf32>
    %321 = arith.mulf %316, %320 : vector<16x32xf32>
    %322 = vector.broadcast %301 : vector<1x32xf32> to vector<16x32xf32>
    %323 = arith.mulf %321, %322 : vector<16x32xf32>
    %324 = vector.broadcast %303 : vector<1x32xf32> to vector<16x32xf32>
    %325 = arith.addf %323, %324 : vector<16x32xf32>
    %c1_150 = arith.constant 1 : index
    %c0_151 = arith.constant 0 : index
    %c0_152 = arith.constant 0 : index
    %326 = vector.load %arg10[%c1_150, %c0_151, %c0_152] : memref<2x32x128xf32, #tpu.memory_space<vmem>>, vector<1x32x128xf32>
    %327 = vector.shape_cast %326 : vector<1x32x128xf32> to vector<32x128xf32>
    %cst_153 = arith.constant dense<0.000000e+00> : vector<16x128xf32>
    %328 = tpu.matmul %325, %327, %cst_153 {dimension_numbers = #tpu.dot_dimension_numbers<[1], [0], [0], [1], [0, 0, 1, 1], [], []>} : vector<16x32xf32>, vector<32x128xf32>, vector<16x128xf32> -> vector<16x128xf32>
    %c1_154 = arith.constant 1 : index
    %c0_155 = arith.constant 0 : index
    %c0_156 = arith.constant 0 : index
    %329 = vector.load %arg11[%c1_154, %c0_155, %c0_156] : memref<2x1x128xf32, #tpu.memory_space<vmem>>, vector<1x1x128xf32>
    %330 = vector.shape_cast %329 : vector<1x1x128xf32> to vector<1x128xf32>
    %331 = vector.broadcast %330 : vector<1x128xf32> to vector<16x128xf32>
    %332 = arith.addf %328, %331 : vector<16x128xf32>
    %cst_157 = arith.constant 5.000000e-01 : f32
    %333 = vector.broadcast %cst_157 : f32 to vector<16x128xf32>
    %334 = arith.mulf %333, %332 : vector<16x128xf32>
    %cst_158 = arith.constant 4.471500e-02 : f32
    %335 = vector.broadcast %cst_158 : f32 to vector<16x128xf32>
    %336 = arith.mulf %335, %332 : vector<16x128xf32>
    %337 = arith.mulf %336, %332 : vector<16x128xf32>
    %338 = arith.mulf %337, %332 : vector<16x128xf32>
    %339 = arith.addf %332, %338 : vector<16x128xf32>
    %cst_159 = arith.constant 0.797884583 : f32
    %340 = vector.broadcast %cst_159 : f32 to vector<16x128xf32>
    %341 = arith.mulf %340, %339 : vector<16x128xf32>
    %342 = math.tanh %341 : vector<16x128xf32>
    %cst_160 = arith.constant 1.000000e+00 : f32
    %343 = vector.broadcast %cst_160 : f32 to vector<16x128xf32>
    %344 = arith.addf %343, %342 : vector<16x128xf32>
    %345 = arith.mulf %334, %344 : vector<16x128xf32>
    %c1_161 = arith.constant 1 : index
    %c0_162 = arith.constant 0 : index
    %c0_163 = arith.constant 0 : index
    %346 = vector.load %arg12[%c1_161, %c0_162, %c0_163] : memref<2x128x32xf32, #tpu.memory_space<vmem>>, vector<1x128x32xf32>
    %347 = vector.shape_cast %346 : vector<1x128x32xf32> to vector<128x32xf32>
    %cst_164 = arith.constant dense<0.000000e+00> : vector<16x32xf32>
    %348 = tpu.matmul %345, %347, %cst_164 {dimension_numbers = #tpu.dot_dimension_numbers<[1], [0], [0], [1], [0, 0, 1, 1], [], []>} : vector<16x128xf32>, vector<128x32xf32>, vector<16x32xf32> -> vector<16x32xf32>
    %349 = arith.addf %299, %348 : vector<16x32xf32>
    %c1_165 = arith.constant 1 : index
    %c0_166 = arith.constant 0 : index
    %c0_167 = arith.constant 0 : index
    %350 = vector.load %arg13[%c1_165, %c0_166, %c0_167] : memref<2x1x32xf32, #tpu.memory_space<vmem>>, vector<1x1x32xf32>
    %351 = vector.shape_cast %350 : vector<1x1x32xf32> to vector<1x32xf32>
    %352 = vector.broadcast %351 : vector<1x32xf32> to vector<16x32xf32>
    %353 = arith.addf %349, %352 : vector<16x32xf32>
    %c0_168 = arith.constant 0 : index
    %c0_169 = arith.constant 0 : index
    %354 = vector.load %arg14[%c0_168, %c0_169] : memref<1x32xf32, #tpu.memory_space<vmem>>, vector<1x32xf32>
    %c0_170 = arith.constant 0 : index
    %c0_171 = arith.constant 0 : index
    %355 = vector.load %arg15[%c0_170, %c0_171] : memref<1x32xf32, #tpu.memory_space<vmem>>, vector<1x32xf32>
    %cst_172 = arith.constant dense<0.000000e+00> : vector<16xf32>
    %356 = vector.multi_reduction <add>, %353, %cst_172 [1] : vector<16x32xf32> to vector<16xf32>
    %357 = vector.shape_cast %356 : vector<16xf32> to vector<16x1xf32>
    %cst_173 = arith.constant 3.200000e+01 : f32
    %358 = vector.broadcast %cst_173 : f32 to vector<16x1xf32>
    %359 = arith.divf %357, %358 : vector<16x1xf32>
    %360 = vector.broadcast %359 : vector<16x1xf32> to vector<16x32xf32>
    %361 = arith.subf %353, %360 : vector<16x32xf32>
    %362 = arith.mulf %361, %361 : vector<16x32xf32>
    %cst_174 = arith.constant dense<0.000000e+00> : vector<16xf32>
    %363 = vector.multi_reduction <add>, %362, %cst_174 [1] : vector<16x32xf32> to vector<16xf32>
    %364 = vector.shape_cast %363 : vector<16xf32> to vector<16x1xf32>
    %cst_175 = arith.constant 3.200000e+01 : f32
    %365 = vector.broadcast %cst_175 : f32 to vector<16x1xf32>
    %366 = arith.divf %364, %365 : vector<16x1xf32>
    %367 = vector.broadcast %359 : vector<16x1xf32> to vector<16x32xf32>
    %368 = arith.subf %353, %367 : vector<16x32xf32>
    %cst_176 = arith.constant 9.99999974E-6 : f32
    %369 = vector.broadcast %cst_176 : f32 to vector<16x1xf32>
    %370 = arith.addf %366, %369 : vector<16x1xf32>
    %371 = math.rsqrt %370 : vector<16x1xf32>
    %372 = vector.broadcast %371 : vector<16x1xf32> to vector<16x32xf32>
    %373 = arith.mulf %368, %372 : vector<16x32xf32>
    %374 = vector.broadcast %354 : vector<1x32xf32> to vector<16x32xf32>
    %375 = arith.mulf %373, %374 : vector<16x32xf32>
    %376 = vector.broadcast %355 : vector<1x32xf32> to vector<16x32xf32>
    %377 = arith.addf %375, %376 : vector<16x32xf32>
    %c0_177 = arith.constant 0 : index
    %c0_178 = arith.constant 0 : index
    %378 = vector.load %arg16[%c0_177, %c0_178] : memref<32x128xf32, #tpu.memory_space<vmem>>, vector<32x128xf32>
    %cst_179 = arith.constant dense<0.000000e+00> : vector<16x128xf32>
    %379 = tpu.matmul %377, %378, %cst_179 {dimension_numbers = #tpu.dot_dimension_numbers<[1], [0], [0], [1], [0, 0, 1, 1], [], []>} : vector<16x32xf32>, vector<32x128xf32>, vector<16x128xf32> -> vector<16x128xf32>
    %c0_180 = arith.constant 0 : index
    %c0_181 = arith.constant 0 : index
    %380 = vector.load %arg17[%c0_180, %c0_181] : memref<1x128xf32, #tpu.memory_space<vmem>>, vector<1x128xf32>
    %381 = vector.broadcast %380 : vector<1x128xf32> to vector<16x128xf32>
    %382 = arith.addf %379, %381 : vector<16x128xf32>
    %c0_182 = arith.constant 0 : index
    %c0_183 = arith.constant 0 : index
    %383 = vector.load %arg18[%c0_182, %c0_183] : memref<16x128xf32, #tpu.memory_space<vmem>>, vector<16x128xf32>
    tpu.vector_store %arg18[%c0_182, %c0_183], %382 {strides = array<i32>} : memref<16x128xf32, #tpu.memory_space<vmem>>, vector<16x128xf32>,
    return
  }
}

</mosaic_0001>

<bundles_post_ra>
// kernel: generator_forward.1
= control target key start
LH: loop header
LB: loop body
LE: loop exit
PB: predicated region body
PF: predicated region fallthrough
CT: control target
= control target key end

     0   :  { %vm65_vm0 = vcmask 261120   ;;  %v1486_v4 = vmov 32.0   ;;  %s1488_s20 = smov 80   ;;  %s1489_s21 = smov 96   ;;  %vm167_vm8 = vcmask 130048   ;;  %vm194_vm9 = vcmask 64512   ;;  %s2063_s0 = inlined_call_operand.vmem [shape: f32[16,32], index: 0, kind: input, shape index: {}]   ;;  %s2064_s2 = inlined_call_operand.vmem [shape: f32[2,1,32], index: 2, kind: input, shape index: {}]   ;;  %s2065_s3 = inlined_call_operand.vmem [shape: f32[2,1,32], index: 3, kind: input, shape index: {}]   ;;  %s2066_s5 = inlined_call_operand.vmem [shape: f32[2,1,96], index: 5, kind: input, shape index: {}]   ;;  %s2067_s4 = inlined_call_operand.vmem [shape: f32[2,32,96], index: 4, kind: input, shape index: {}]   ;;  %s2068_s1 = inlined_call_operand.vmem [shape: f32[2,8,8], index: 1, kind: input, shape index: {}]   ;;  %s2069_s6 = inlined_call_operand.vmem [shape: f32[2,32,32], index: 6, kind: input, shape index: {}]   ;;  %s2070_s7 = inlined_call_operand.vmem [shape: f32[2,1,32], index: 7, kind: input, shape index: {}]   ;;  %s2071_s8 = inlined_call_operand.vmem [shape: f32[2,1,32], index: 8, kind: input, shape index: {}]   ;;  %s2072_s9 = inlined_call_operand.vmem [shape: f32[2,1,32], index: 9, kind: input, shape index: {}]   ;;  %s2073_s10 = inlined_call_operand.vmem [shape: f32[2,32,128], index: 10, kind: input, shape index: {}]   ;;  %s2074_s11 = inlined_call_operand.vmem [shape: f32[2,1,128], index: 11, kind: input, shape index: {}]   ;;  %s2075_s12 = inlined_call_operand.vmem [shape: f32[2,128,32], index: 12, kind: input, shape index: {}]   ;;  %s2076_s13 = inlined_call_operand.vmem [shape: f32[2,1,32], index: 13, kind: input, shape index: {}]   ;;  %s2077_s14 = inlined_call_operand.vmem [shape: f32[1,32], index: 14, kind: input, shape index: {}]   ;;  %s2078_s15 = inlined_call_operand.vmem [shape: f32[1,32], index: 15, kind: input, shape index: {}]   ;;  %s2079_s16 = inlined_call_operand.vmem [shape: f32[32,128], index: 16, kind: input, shape index: {}]   ;;  %s2080_s17 = inlined_call_operand.vmem [shape: f32[1,128], index: 17, kind: input, shape index: {}]   ;;  %s2081_s18 = inlined_call_operand.vmem [shape: f32[16,128], index: 18, kind: output, shape index: {}]  }
   0x1   :  { %2089 = sst [smem:[#allocation3_spill]] %s2063_s0  ;;  %1424 = vrcp.f32 %v1486_v4  ;;  %v130_v21 = vld [vmem:[%s2067_s4 + $0x18] sm:$0xff]  ;;  %v129_v22 = vld [vmem:[%s2067_s4 + $0x10] sm:$0xff]  ;;  %v128_v23 = vld [vmem:[%s2067_s4 + $0x8] sm:$0xff]  ;;  %s1490_s22 = smov 64   ;;  %vm304_vm10 = vcmask 261248  }
   0x2   :  { %2090 = sst [smem:[#allocation4_spill]] %s2064_s2  ;;  %153 = vmatpush.msra.mxu0 %v130_v21  ;;  %v127_v24 = vld [vmem:[%s2067_s4] sm:$0xff]  ;;  %s1487_s2 = smov 112  }
   0x3   :  { %2091 = sst [smem:[#allocation5_spill]] %s2065_s3  ;;  %v1410_v53 = vld [vmem:[%s2066_s5] ss:$0 sm:$0xff]  ;;  %s2087_s26 = smov 48  }
   0x4   :  { %s2092_s29 = sld [smem:[#allocation3_spill]]  ;;  %154 = vmatpush.msra.mxu0 %v129_v22  ;;  %v1664_v4 = vld [vmem:[%s2068_s1] sm:$0xff] }
   0x5   :  { %s2093_s27 = sld [smem:[#allocation4_spill]] }
   0x6   :  { %155 = vmatpush.msra.mxu0 %v128_v23  ;;  %s2094_s30 = sld [smem:[#allocation5_spill]] }
   0x7   :  { %v1425_v5 = vpop.eup %1424 }
   0x8   :  { %v73_v6 = vmul.f32 32.0, %v1425_v5  ;;  %vm77_vm1 = vweird.f32 %v1425_v5  ;;  %156 = vmatpush.msra.mxu0 %v127_v24  ;;  %v1676_v24 = vld [vmem:[%s2068_s1 + $0x8] sm:$0xff]  ;;  %s2085_s1 = smov 16  }
   0xa   :  { %v1591_v0 = vld [vmem:[%s2092_s29] sm:$0xff]  ;;  %v1596_v1 = vld [vmem:[%s2092_s29 + $0x8] sm:$0xff]  ;;  %v74_v7 = vsub.f32 1.0, %v73_v6 }
   0xb   :  { %v66_v2 = vsel %vm65_vm0, %v1591_v0, 0.0  ;;  %v69_v3 = vsel %vm65_vm0, %v1596_v1, 0.0  ;;  %v1406_v43 = vld [vmem:[%s2093_s27] ss:$0 sm:$0xff] }
   0xc   :  { %67 = vadd.xlane.f32.xlu0 %v66_v2  ;;  %70 = vadd.xlane.f32.xlu1 %v69_v3  ;;  %v75_v8 = vmul.f32 %v1425_v5, %v74_v7  ;;  %v1407_v47 = vld [vmem:[%s2094_s30] ss:$0 sm:$0xff] }
   0xe   :  { %v76_v9 = vadd.f32 %v1425_v5, %v75_v8 }
  0x10   :  { %v1602_v10 = vsel %vm77_vm1, %v1425_v5, %v76_v9 }
  0x7f   :  { %v68_v11 = vpop.xlane.xlu0 %67  ;;  %v71_v12 = vpop.xlane.xlu1 %70 }
  0x80   :  { %v79_v13 = vmul.f32 %v1602_v10, %v68_v11  ;;  %v80_v14 = vmul.f32 %v1602_v10, %v71_v12 }
  0x82   :  { %v81_v15 = vsub.f32 %v1591_v0, %v79_v13  ;;  %v82_v16 = vsub.f32 %v1596_v1, %v80_v14 }
  0x84   :  { %v83_v17 = vmul.f32 %v81_v15, %v81_v15  ;;  %v84_v18 = vmul.f32 %v82_v16, %v82_v16 }
  0x86   :  { %v85_v19 = vsel %vm65_vm0, %v83_v17, 0.0  ;;  %v88_v20 = vsel %vm65_vm0, %v84_v18, 0.0 }
  0x87   :  { %86 = vadd.xlane.f32.xlu0 %v85_v19  ;;  %89 = vadd.xlane.f32.xlu2 %v88_v20 }
  0xfa   :  { %v87_v25 = vpop.xlane.xlu0 %86  ;;  %v90_v26 = vpop.xlane.xlu2 %89 }
  0xfb   :  { %v91_v27 = vmul.f32 %v87_v25, %v1602_v10  ;;  %v92_v28 = vmul.f32 %v90_v26, %v1602_v10 }
  0xfd   :  { %v93_v29 = vadd.f32 1e-05, %v91_v27  ;;  %v94_v30 = vadd.f32 1e-05, %v92_v28 }
  0xff   :  { %1426 = vrsqrt.f32 %v93_v29  ;;  %vm111_vm2 = vweird.f32 %v94_v30  ;;  %vm101_vm5 = vweird.f32 %v93_v29 }
 0x100   :  { %1428 = vrsqrt.f32 %v94_v30 }
 0x105   :  { %v1427_v31 = vpop.eup %1426 }
 0x106   :  { %v1429_v32 = vpop.eup %1428  ;;  %v96_v33 = vmul.f32 %v1427_v31, %v93_v29  ;;  %vm102_vm4 = vweird.f32 %v1427_v31 }
 0x107   :  { %v106_v34 = vmul.f32 %v1429_v32, %v94_v30  ;;  %vm112_vm3 = vweird.f32 %v1429_v32  ;;  %vm103_vm7 = vmor %vm101_vm5, %vm102_vm4 }
 0x108   :  { %v97_v35 = vmul.f32 %v1427_v31, %v96_v33  ;;  %vm113_vm6 = vmor %vm111_vm2, %vm112_vm3 }
 0x109   :  { %v107_v36 = vmul.f32 %v1429_v32, %v106_v34 }
 0x10a   :  { %v98_v37 = vmul.f32 0.5, %v97_v35 }
 0x10b   :  { %v108_v38 = vmul.f32 0.5, %v107_v36 }
 0x10c   :  { %v99_v39 = vsub.f32 1.5, %v98_v37 }
 0x10d   :  { %v109_v40 = vsub.f32 1.5, %v108_v38 }
 0x10e   :  { %v100_v41 = vmul.f32 %v1427_v31, %v99_v39 }
 0x10f   :  { %v110_v42 = vmul.f32 %v1429_v32, %v109_v40 }
 0x110   :  { %v104_v44 = vsel %vm103_vm7, %v1427_v31, %v100_v41 }
 0x111   :  { %v114_v45 = vsel %vm113_vm6, %v1429_v32, %v110_v42  ;;  %v115_v46 = vmul.f32 %v104_v44, %v81_v15 }
 0x112   :  { %v116_v49 = vmul.f32 %v114_v45, %v82_v16 }
 0x113   :  { %v120_v48 = vmul.f32 %v1406_v43, %v115_v46 }
 0x114   :  { %v121_v51 = vmul.f32 %v1406_v43, %v116_v49 }
 0x115   :  { %v125_v50 = vadd.f32 %v1407_v47, %v120_v48 }
 0x116   :  { %v126_v52 = vadd.f32 %v1407_v47, %v121_v51 }
 0x117   :  { %1325 = vmatmul.msk.f32.vlgmr.msra.gmra.mxu0 %vm65_vm0, %v125_v50 }
 0x11f   :  { %1326 = vmatmul.msk.f32.gmra.mxu0 %vm65_vm0, %v126_v52 }
 0x194   :  { %v158_v54 = vpop.f32.mrf.mxu0 }
 0x195   :  { %v1635_v55 = vadd.f32 %v1410_v53, %v158_v54 }
 0x197   :  { %233 = vrot.lane.b32.xlu0 %v1635_v55, %s1487_s2  ;;  %235 = vrot.lane.b32.xlu2 %v1635_v55, %s1488_s20 }
 0x198   :  { %165 = vrot.lane.b32.xlu1 %v1635_v55, %s1489_s21 }
 0x19c   :  { %v161_v56 = vpop.f32.mrf.mxu0 }
 0x19d   :  { %v1643_v57 = vadd.f32 %v1410_v53, %v161_v56 }
 0x19f   :  { %375 = vrot.lane.b32.xlu0 %v1643_v57, %s1488_s20 }
 0x1a7   :  { %206 = vrot.lane.b32.xlu0 %v1635_v55, %s1490_s22 }
 0x1af   :  { %373 = vrot.lane.b32.xlu0 %v1643_v57, %s1487_s2 }
 0x1b7   :  { %307 = vrot.lane.b32.xlu0 %v1643_v57, %s1489_s21 }
 0x1f1   :  { %v236_v58 = vpop.permute.xlu2 %235 }
 0x1f2   :  { %1330 = vmatpush.xpose.msk.msra.mxu3 %vm167_vm8, %v236_v58  ;;  %v449_v58 = vld [vmem:[%s2069_s6 + $0x10] sm:$0xff] }
 0x209   :  { %v234_v59 = vpop.permute.xlu0 %233 }
 0x20a   :  { %v166_v60 = vpop.permute.xlu1 %165  ;;  %1331 = vmatmul.msk.f32.vlgmr.msra.gmra.mxu3 %vm167_vm8, %v234_v59  ;;  %v448_v59 = vld [vmem:[%s2069_s6 + $0x8] sm:$0xff] }
 0x20b   :  { %1327 = vmatpush.xpose.msk.msra.mxu1 %vm167_vm8, %v166_v60  ;;  %v447_v60 = vld [vmem:[%s2069_s6] sm:$0xff] }
 0x20e   :  { %1328 = vmatmul.msk.f32.vlgmr.msra.gmra.mxu1 %vm167_vm8, %v1635_v55 }
 0x211   :  { %v376_v61 = vpop.permute.xlu0 %375 }
 0x212   :  { %1336 = vmatpush.xpose.msk.msra.mxu2 %vm167_vm8, %v376_v61 }
 0x219   :  { %v207_v62 = vpop.permute.xlu0 %206 }
 0x21a   :  { %227 = vmatpush.msrb.mxu1 %v207_v62 }
 0x221   :  { %v374_v63 = vpop.permute.xlu0 %373 }
 0x222   :  { %1337 = vmatmul.msk.f32.vlgmr.msra.gmra.mxu2 %vm167_vm8, %v374_v63 }
 0x229   :  { %v308_v2 = vpop.permute.xlu0 %307 }
 0x22a   :  { %1333 = vmatpush.xpose.msk.msra.mxu1 %vm167_vm8, %v308_v2 }
 0x28b   :  { %v189_v3 = vpop.f32.mrf.mxu1 }
 0x28c   :  { %v192_v5 = vmul.f32 0.25, %v189_v3 }
 0x28d   :  { %v258_v6 = vpop.f32.mrf.mxu3 }
 0x28e   :  { %v261_v7 = vmul.f32 0.25, %v258_v6  ;;  %v193_v8 = vadd.f32 %v192_v5, %v1664_v4 }
 0x290   :  { %v195_v9 = vsel %vm194_vm9, %v193_v8, -inf  ;;  %v262_v11 = vadd.f32 %v261_v7, %v1664_v4  ;;  %v1411_v7 = vld [vmem:[%s2070_s7] ss:$0 sm:$0xff] }
 0x291   :  { %196 = vmax.xlane.f32.xlu2 %v195_v9 }
 0x292   :  { %v263_v12 = vsel %vm194_vm9, %v262_v11, -inf }
 0x293   :  { %264 = vmax.xlane.f32.xlu0 %v263_v12 }
 0x2a5   :  { %v398_v19 = vpop.f32.mrf.mxu2 }
 0x2a6   :  { %v401_v22 = vmul.f32 0.25, %v398_v19 }
 0x2a7   :  { %346 = vrot.lane.b32.xlu0 %v1643_v57, %s1490_s22 }
 0x2a8   :  { %v402_v26 = vadd.f32 %v401_v22, %v1676_v24  ;;  %v545_v22 = vld [vmem:[%s2073_s10 + $0x18] sm:$0xff] }
 0x2a9   :  { %568 = vmatpush.msrb.mxu0 %v545_v22 }
 0x2aa   :  { %v403_v27 = vsel %vm194_vm9, %v402_v26, -inf }
 0x304   :  { %v197_v13 = vpop.xlane.xlu2 %196 }
 0x305   :  { %v198_v14 = vsub.f32 %v193_v8, %v197_v13 }
 0x306   :  { %v265_v15 = vpop.xlane.xlu0 %264 }
 0x307   :  { %v199_v16 = vmul.f32 1.442695, %v198_v14  ;;  %v266_v17 = vsub.f32 %v262_v11, %v265_v15 }
 0x309   :  { %1430 = vpow2.f32 %v199_v16  ;;  %v267_v18 = vmul.f32 1.442695, %v266_v17 }
 0x30b   :  { %1432 = vpow2.f32 %v267_v18 }
 0x30f   :  { %v1431_v20 = vpop.eup %1430 }
 0x310   :  { %v201_v21 = vsel %vm194_vm9, %v1431_v20, 0.0 }
 0x311   :  { %v1433_v23 = vpop.eup %1432  ;;  %202 = vadd.xlane.f32.xlu1 %v201_v21 }
 0x312   :  { %v269_v25 = vsel %vm194_vm9, %v1433_v23, 0.0 }
 0x313   :  { %270 = vadd.xlane.f32.xlu2 %v269_v25  ;;  %v543_v25 = vld [vmem:[%s2073_s10 + $0x8] sm:$0xff] }
 0x319   :  { %v347_v35 = vpop.permute.xlu0 %346 }
 0x31b   :  { %404 = vmax.xlane.f32.xlu2 %v403_v27 }
 0x32a   :  { %274 = vrot.lane.b32.xlu1 %v1635_v55, %s2087_s26 }
 0x384   :  { %v203_v28 = vpop.xlane.xlu1 %202 }
 0x385   :  { %1434 = vrcp.f32 %v203_v28 }
 0x386   :  { %v271_v31 = vpop.xlane.xlu2 %270 }
 0x387   :  { %1436 = vrcp.f32 %v271_v31 }
 0x38b   :  { %v1435_v29 = vpop.eup %1434 }
 0x38c   :  { %v205_v30 = vmul.f32 %v1435_v29, %v1431_v20 }
 0x38d   :  { %v1437_v32 = vpop.eup %1436 }
 0x38e   :  { %1329 = vmatmul.msk.f32.vlgmr.msrb.gmra.mxu1 %vm194_vm9, %v205_v30  ;;  %v273_v34 = vmul.f32 %v1437_v32, %v1433_v23  ;;  %v405_v37 = vpop.xlane.xlu2 %404  ;;  %v544_v23 = vld [vmem:[%s2073_s10 + $0x10] sm:$0xff] }
 0x38f   :  { %v406_v38 = vsub.f32 %v402_v26, %v405_v37  ;;  %569 = vmatpush.msrb.mxu0 %v544_v23 }
 0x391   :  { %v407_v39 = vmul.f32 1.442695, %v406_v38  ;;  %570 = vmatpush.msrb.mxu0 %v543_v25 }
 0x393   :  { %1438 = vpow2.f32 %v407_v39 }
 0x396   :  { %1334 = vmatmul.msk.f32.vlgmr.msra.gmra.mxu1 %vm167_vm8, %v1643_v57 }
 0x399   :  { %v1439_v44 = vpop.eup %1438 }
 0x39a   :  { %v409_v45 = vsel %vm194_vm9, %v1439_v44, 0.0 }
 0x39c   :  { %v275_v33 = vpop.permute.xlu1 %274 }
 0x39d   :  { %295 = vmatpush.msrb.mxu3 %v275_v33 }
 0x39e   :  { %1332 = vmatmul.msk.f32.vlgmr.msrb.gmra.mxu3 %vm194_vm9, %v273_v34 }
 0x39f   :  { %367 = vmatpush.msra.mxu3 %v347_v35 }
 0x40b   :  { %v229_v36 = vpop.f32.mrf.mxu1 }
 0x40c   :  { %232 = vst.msk [vmem:[#allocation2] sm:$0xff] %vm167_vm8, %v229_v36 }
 0x413   :  { %v330_v40 = vpop.f32.mrf.mxu1 }
 0x414   :  { %v333_v41 = vmul.f32 0.25, %v330_v40  ;;  %v1412_v40 = vld [vmem:[%s2071_s8] ss:$0 sm:$0xff] }
 0x416   :  { %v334_v42 = vadd.f32 %v333_v41, %v1676_v24 }
 0x418   :  { %v335_v43 = vsel %vm194_vm9, %v334_v42, -inf }
 0x419   :  { %336 = vmax.xlane.f32.xlu2 %v335_v43  ;;  %v1413_v43 = vld [vmem:[%s2072_s9] ss:$0 sm:$0xff] }
 0x421   :  { %410 = vadd.xlane.f32.xlu2 %v409_v45  ;;  %v297_v46 = vpop.f32.mrf.mxu3 }
 0x439   :  { %414 = vrot.lane.b32.xlu2 %v1643_v57, %s2087_s26  ;;  %v450_v57 = vld [vmem:[%s2069_s6 + $0x18] sm:$0xff] }
 0x43a   :  { %473 = vmatpush.msrb.mxu3 %v450_v57  ;;  %v602_v57 = vld [vmem:[%s2075_s12 + $0x28] sm:$0xff] }
 0x43c   :  { %474 = vmatpush.msrb.mxu3 %v449_v58 }
 0x43e   :  { %475 = vmatpush.msrb.mxu3 %v448_v59  ;;  %v601_v59 = vld [vmem:[%s2075_s12 + $0x20] sm:$0xff] }
 0x440   :  { %476 = vmatpush.msrb.mxu3 %v447_v60 }
 0x441   :  { %301 = vrot.lane.b32.xlu2 %v297_v46, %s2085_s1  ;;  %v612_v46 = vld [vmem:[%s2075_s12 + $0x78] sm:$0xff] }
 0x442   :  { %613 = vmatpush.msrb.mxu2 %v612_v46 }
 0x48c   :  { %v337_v47 = vpop.xlane.xlu2 %336 }
 0x48d   :  { %v338_v48 = vsub.f32 %v334_v42, %v337_v47  ;;  %v611_v47 = vld [vmem:[%s2075_s12 + $0x70] sm:$0xff] }
 0x48e   :  { %614 = vmatpush.msrb.mxu2 %v611_v47 }
 0x48f   :  { %v339_v49 = vmul.f32 1.442695, %v338_v48  ;;  %v610_v48 = vld [vmem:[%s2075_s12 + $0x68] sm:$0xff] }
 0x490   :  { %615 = vmatpush.msrb.mxu2 %v610_v48 }
 0x491   :  { %1440 = vpow2.f32 %v339_v49  ;;  %v609_v49 = vld [vmem:[%s2075_s12 + $0x60] sm:$0xff] }
 0x492   :  { %616 = vmatpush.msrb.mxu2 %v609_v49 }
 0x494   :  { %v411_v50 = vpop.xlane.xlu2 %410 }
 0x495   :  { %1442 = vrcp.f32 %v411_v50  ;;  %v608_v50 = vld [vmem:[%s2075_s12 + $0x58] sm:$0xff] }
 0x496   :  { %617 = vmatpush.msrb.mxu2 %v608_v50 }
 0x497   :  { %v1441_v51 = vpop.eup %1440 }
 0x498   :  { %v341_v52 = vsel %vm194_vm9, %v1441_v51, 0.0 }
 0x499   :  { %342 = vadd.xlane.f32.xlu1 %v341_v52  ;;  %v606_v52 = vld [vmem:[%s2075_s12 + $0x48] sm:$0xff] }
 0x49b   :  { %v1443_v53 = vpop.eup %1442 }
 0x49c   :  { %v413_v54 = vmul.f32 %v1443_v53, %v1439_v44  ;;  %v415_v55 = vpop.permute.xlu2 %414  ;;  %v605_v53 = vld [vmem:[%s2075_s12 + $0x40] sm:$0xff] }
 0x49d   :  { %435 = vmatpush.msrb.mxu1 %v415_v55  ;;  %v603_v55 = vld [vmem:[%s2075_s12 + $0x30] sm:$0xff] }
 0x49e   :  { %1338 = vmatmul.msk.f32.vlgmr.msrb.gmra.mxu1 %vm194_vm9, %v413_v54  ;;  %v604_v54 = vld [vmem:[%s2075_s12 + $0x38] sm:$0xff] }
 0x4a4   :  { %v302_v56 = vpop.permute.xlu2 %301 }
 0x4a5   :  { %305 = vst.msk [vmem:[#allocation2] sm:$0xff] %vm304_vm10, %v302_v56 }
 0x4ac   :  { %v445_v3 = vld [vmem:[#allocation2] sm:$0xff] }
 0x50c   :  { %v343_v61 = vpop.xlane.xlu1 %342 }
 0x50d   :  { %1444 = vrcp.f32 %v343_v61  ;;  %v600_v61 = vld [vmem:[%s2075_s12 + $0x18] sm:$0xff] }
 0x513   :  { %v1445_v62 = vpop.eup %1444 }
 0x514   :  { %v345_v63 = vmul.f32 %v1445_v62, %v1441_v51  ;;  %v607_v51 = vld [vmem:[%s2075_s12 + $0x50] sm:$0xff] }
 0x515   :  { %618 = vmatpush.msrb.mxu2 %v607_v51  ;;  %v599_v62 = vld [vmem:[%s2075_s12 + $0x10] sm:$0xff] }
 0x516   :  { %1335 = vmatmul.msk.f32.vlgmr.msra.gmra.mxu3 %vm194_vm9, %v345_v63  ;;  %v598_v63 = vld [vmem:[%s2075_s12 + $0x8] sm:$0xff] }
 0x517   :  { %619 = vmatpush.msrb.mxu2 %v606_v52  ;;  %v1348_v52 = vld [vmem:[%s2067_s4 + $0x38] sm:$0xff] }
 0x518   :  { %730 = vmatpush.msra.mxu1 %v1348_v52 }
 0x519   :  { %620 = vmatpush.msrb.mxu2 %v605_v53  ;;  %v1347_v53 = vld [vmem:[%s2067_s4 + $0x30] sm:$0xff] }
 0x51a   :  { %731 = vmatpush.msra.mxu1 %v1347_v53 }
 0x51b   :  { %v437_v2 = vpop.f32.mrf.mxu1  ;;  %621 = vmatpush.msrb.mxu2 %v604_v54  ;;  %v1345_v54 = vld [vmem:[%s2067_s4 + $0x20] sm:$0xff] }
 0x51c   :  { %441 = vrot.lane.b32.xlu0 %v437_v2, %s2085_s1  ;;  %v597_v2 = vld [vmem:[%s2075_s12] sm:$0xff] }
 0x51d   :  { %622 = vmatpush.msrb.mxu2 %v603_v55 }
 0x51e   :  { %1339 = vmatmul.msk.f32.vlgmr.msrb.gmra.mxu3 %vm65_vm0, %v445_v3 }
 0x51f   :  { %623 = vmatpush.msrb.mxu2 %v602_v57 }
 0x521   :  { %624 = vmatpush.msrb.mxu2 %v601_v59 }
 0x523   :  { %625 = vmatpush.msrb.mxu2 %v600_v61 }
 0x525   :  { %626 = vmatpush.msrb.mxu2 %v599_v62 }
 0x527   :  { %627 = vmatpush.msrb.mxu2 %v598_v63 }
 0x529   :  { %628 = vmatpush.msrb.mxu2 %v597_v2 }
 0x58e   :  { %v442_v6 = vpop.permute.xlu0 %441 }
 0x599   :  { %v369_v5 = vpop.f32.mrf.mxu3 }
 0x59a   :  { %372 = vst.msk [vmem:[#allocation2 + $0x8] sm:$0xff] %vm167_vm8, %v369_v5 }
 0x59b   :  { %444 = vst.msk [vmem:[#allocation2 + $0x8] sm:$0xff] %vm304_vm10, %v442_v6 }
 0x5a1   :  { %v478_v8 = vpop.f32.mrf.mxu3 }
 0x5a2   :  { %v479_v9 = vadd.f32 %v1411_v7, %v478_v8  ;;  %v446_v11 = vld [vmem:[#allocation2 + $0x8] sm:$0xff] }
 0x5a3   :  { %1340 = vmatmul.msk.f32.gmra.mxu3 %vm65_vm0, %v446_v11 }
 0x5a4   :  { %v1719_v12 = vadd.f32 %v479_v9, %v1591_v0  ;;  %v1415_v9 = vld [vmem:[%s2074_s11] ss:$0 sm:$0xff] }
 0x5a6   :  { %v488_v13 = vsel %vm65_vm0, %v1719_v12, 0.0 }
 0x5a7   :  { %489 = vadd.xlane.f32.xlu2 %v488_v13 }
 0x61a   :  { %v490_v14 = vpop.xlane.xlu2 %489 }
 0x61b   :  { %v494_v15 = vmul.f32 %v490_v14, %v1602_v10 }
 0x61d   :  { %v496_v16 = vsub.f32 %v1719_v12, %v494_v15 }
 0x61f   :  { %v498_v17 = vmul.f32 %v496_v16, %v496_v16 }
 0x621   :  { %v500_v18 = vsel %vm65_vm0, %v498_v17, 0.0 }
 0x622   :  { %501 = vadd.xlane.f32.xlu0 %v500_v18 }
 0x626   :  { %v481_v19 = vpop.f32.mrf.mxu3 }
 0x627   :  { %v482_v20 = vadd.f32 %v1411_v7, %v481_v19 }
 0x629   :  { %v1727_v21 = vadd.f32 %v482_v20, %v1596_v1  ;;  %v542_v1 = vld [vmem:[%s2073_s10] sm:$0xff] }
 0x62a   :  { %571 = vmatpush.msrb.mxu0 %v542_v1 }
 0x62b   :  { %v491_v0 = vsel %vm65_vm0, %v1727_v21, 0.0 }
 0x62c   :  { %492 = vadd.xlane.f32.xlu1 %v491_v0 }
 0x695   :  { %v502_v26 = vpop.xlane.xlu0 %501 }
 0x696   :  { %v506_v27 = vmul.f32 %v502_v26, %v1602_v10 }
 0x698   :  { %v508_v28 = vadd.f32 1e-05, %v506_v27 }
 0x69a   :  { %1446 = vrsqrt.f32 %v508_v28  ;;  %vm516_vm12 = vweird.f32 %v508_v28 }
 0x69f   :  { %v493_v29 = vpop.xlane.xlu1 %492 }
 0x6a0   :  { %v1447_v30 = vpop.eup %1446  ;;  %v495_v31 = vmul.f32 %v493_v29, %v1602_v10 }
 0x6a1   :  { %v511_v32 = vmul.f32 %v1447_v30, %v508_v28  ;;  %vm517_vm11 = vweird.f32 %v1447_v30 }
 0x6a2   :  { %v1746_v33 = vsub.f32 %v1727_v21, %v495_v31  ;;  %vm518_vm13 = vmor %vm516_vm12, %vm517_vm11 }
 0x6a3   :  { %v512_v34 = vmul.f32 %v1447_v30, %v511_v32 }
 0x6a4   :  { %v499_v35 = vmul.f32 %v1746_v33, %v1746_v33 }
 0x6a5   :  { %v513_v36 = vmul.f32 0.5, %v512_v34 }
 0x6a6   :  { %v503_v37 = vsel %vm65_vm0, %v499_v35, 0.0 }
 0x6a7   :  { %v514_v38 = vsub.f32 1.5, %v513_v36  ;;  %504 = vadd.xlane.f32.xlu1 %v503_v37 }
 0x6a9   :  { %v515_v39 = vmul.f32 %v1447_v30, %v514_v38  ;;  %v1416_v38 = vld [vmem:[%s2076_s13] ss:$0 sm:$0xff] }
 0x6ab   :  { %v519_v41 = vsel %vm518_vm13, %v1447_v30, %v515_v39 }
 0x6ac   :  { %v530_v42 = vmul.f32 %v519_v41, %v496_v16 }
 0x6ae   :  { %v535_v44 = vmul.f32 %v1412_v40, %v530_v42 }
 0x6b0   :  { %v540_v45 = vadd.f32 %v1413_v43, %v535_v44 }
 0x6b2   :  { %1341 = vmatmul.msk.f32.vlgmr.msrb.gmra.mxu0 %vm65_vm0, %v540_v45 }
 0x71a   :  { %v505_v56 = vpop.xlane.xlu1 %504 }
 0x71b   :  { %v507_v58 = vmul.f32 %v505_v56, %v1602_v10 }
 0x71d   :  { %v509_v60 = vadd.f32 1e-05, %v507_v58 }
 0x71f   :  { %1448 = vrsqrt.f32 %v509_v60  ;;  %vm526_vm15 = vweird.f32 %v509_v60 }
 0x725   :  { %v1449_v3 = vpop.eup %1448 }
 0x726   :  { %v521_v5 = vmul.f32 %v1449_v3, %v509_v60  ;;  %vm527_vm14 = vweird.f32 %v1449_v3 }
 0x727   :  { %vm528_vm1 = vmor %vm526_vm15, %vm527_vm14 }
 0x728   :  { %v522_v6 = vmul.f32 %v1449_v3, %v521_v5 }
 0x72a   :  { %v523_v7 = vmul.f32 0.5, %v522_v6 }
 0x72c   :  { %v524_v8 = vsub.f32 1.5, %v523_v7 }
 0x72e   :  { %v525_v11 = vmul.f32 %v1449_v3, %v524_v8  ;;  %v1408_v8 = vld [vmem:[%s2093_s27 + $0x1] ss:$0 sm:$0xff] }
 0x72f   :  { %v573_v13 = vpop.f32.mrf.mxu0 }
 0x730   :  { %v529_v14 = vsel %vm528_vm1, %v1449_v3, %v525_v11  ;;  %v574_v15 = vadd.f32 %v1415_v9, %v573_v13  ;;  %v1409_v11 = vld [vmem:[%s2094_s30 + $0x1] ss:$0 sm:$0xff]  ;;  %s2096_s30 = smov 16  }
 0x731   :  { %v531_v16 = vmul.f32 %v529_v14, %v1746_v33 }
 0x732   :  { %v581_v17 = vmul.f32 0.044715, %v574_v15  ;;  %v579_v1 = vmul.f32 0.5, %v574_v15 }
 0x733   :  { %v536_v18 = vmul.f32 %v1412_v40, %v531_v16 }
 0x734   :  { %v583_v19 = vmul.f32 %v581_v17, %v574_v15 }
 0x735   :  { %v541_v20 = vadd.f32 %v1413_v43, %v536_v18 }
 0x736   :  { %v585_v0 = vmul.f32 %v583_v19, %v574_v15 }
 0x737   :  { %1342 = vmatmul.msk.f32.gmra.mxu0 %vm65_vm0, %v541_v20 }
 0x738   :  { %v587_v22 = vadd.f32 %v585_v0, %v574_v15 }
 0x73a   :  { %v589_v23 = vmul.f32 0.7978846, %v587_v22 }
 0x73c   :  { %1450 = vtanh.f32 %v589_v23 }
 0x742   :  { %v1451_v25 = vpop.eup %1450 }
 0x743   :  { %v593_v26 = vadd.f32 1.0, %v1451_v25  ;;  %v1417_v25 = vld [vmem:[%s2066_s5 + $0x1] ss:$0 sm:$0xff]  ;;  %s2095_s5 = smov 48  }
 0x745   :  { %v595_v27 = vmul.f32 %v593_v26, %v579_v1 }
 0x747   :  { %629 = vmatmul.f32.vlgmr.msrb.gmra.mxu2 %v595_v27 }
 0x7b4   :  { %v576_v28 = vpop.f32.mrf.mxu0 }
 0x7b5   :  { %v577_v29 = vadd.f32 %v1415_v9, %v576_v28 }
 0x7b7   :  { %v582_v30 = vmul.f32 0.044715, %v577_v29  ;;  %v580_v36 = vmul.f32 0.5, %v577_v29 }
 0x7b9   :  { %v584_v31 = vmul.f32 %v582_v30, %v577_v29 }
 0x7bb   :  { %v586_v32 = vmul.f32 %v584_v31, %v577_v29 }
 0x7bd   :  { %v588_v33 = vadd.f32 %v586_v32, %v577_v29 }
 0x7bf   :  { %v590_v34 = vmul.f32 0.7978846, %v588_v33 }
 0x7c1   :  { %1452 = vtanh.f32 %v590_v34 }
 0x7c7   :  { %v1453_v35 = vpop.eup %1452 }
 0x7c8   :  { %v594_v37 = vadd.f32 1.0, %v1453_v35 }
 0x7ca   :  { %v630_v39 = vpop.f32.mrf.mxu2  ;;  %v596_v40 = vmul.f32 %v594_v37, %v580_v36 }
 0x7cb   :  { %v636_v41 = vadd.f32 %v630_v39, %v1719_v12 }
 0x7cc   :  { %632 = vmatmul.f32.gmra.mxu2 %v596_v40 }
 0x7cd   :  { %v1816_v42 = vadd.f32 %v1416_v38, %v636_v41 }
 0x7cf   :  { %v648_v43 = vsel %vm65_vm0, %v1816_v42, 0.0 }
 0x7d0   :  { %649 = vadd.xlane.f32.xlu1 %v648_v43 }
 0x843   :  { %v650_v44 = vpop.xlane.xlu1 %649 }
 0x844   :  { %v654_v45 = vmul.f32 %v650_v44, %v1602_v10 }
 0x846   :  { %v656_v46 = vsub.f32 %v1816_v42, %v654_v45 }
 0x848   :  { %v658_v47 = vmul.f32 %v656_v46, %v656_v46 }
 0x84a   :  { %v660_v48 = vsel %vm65_vm0, %v658_v47, 0.0 }
 0x84b   :  { %661 = vadd.xlane.f32.xlu1 %v660_v48 }
 0x84f   :  { %v633_v49 = vpop.f32.mrf.mxu2 }
 0x850   :  { %v637_v50 = vadd.f32 %v633_v49, %v1727_v21  ;;  %v1346_v21 = vld [vmem:[%s2067_s4 + $0x28] sm:$0xff] }
 0x851   :  { %732 = vmatpush.msra.mxu1 %v1346_v21 }
 0x852   :  { %v1824_v12 = vadd.f32 %v1416_v38, %v637_v50 }
 0x853   :  { %733 = vmatpush.msra.mxu1 %v1345_v54 }
 0x854   :  { %v651_v51 = vsel %vm65_vm0, %v1824_v12, 0.0 }
 0x855   :  { %652 = vadd.xlane.f32.xlu1 %v651_v51 }
 0x8be   :  { %v662_v55 = vpop.xlane.xlu1 %661 }
 0x8bf   :  { %v666_v56 = vmul.f32 %v662_v55, %v1602_v10 }
 0x8c1   :  { %v668_v57 = vadd.f32 1e-05, %v666_v56 }
 0x8c3   :  { %1454 = vrsqrt.f32 %v668_v57  ;;  %vm676_vm3 = vweird.f32 %v668_v57 }
 0x8c8   :  { %v653_v58 = vpop.xlane.xlu1 %652 }
 0x8c9   :  { %v1455_v59 = vpop.eup %1454  ;;  %v655_v60 = vmul.f32 %v653_v58, %v1602_v10 }
 0x8ca   :  { %v671_v61 = vmul.f32 %v1455_v59, %v668_v57  ;;  %vm677_vm2 = vweird.f32 %v1455_v59 }
 0x8cb   :  { %v657_v62 = vsub.f32 %v1824_v12, %v655_v60  ;;  %vm678_vm4 = vmor %vm676_vm3, %vm677_vm2 }
 0x8cc   :  { %v672_v63 = vmul.f32 %v1455_v59, %v671_v61 }
 0x8cd   :  { %v659_v2 = vmul.f32 %v657_v62, %v657_v62 }
 0x8ce   :  { %v673_v3 = vmul.f32 0.5, %v672_v63 }
 0x8cf   :  { %v663_v5 = vsel %vm65_vm0, %v659_v2, 0.0 }
 0x8d0   :  { %v674_v6 = vsub.f32 1.5, %v673_v3  ;;  %664 = vadd.xlane.f32.xlu2 %v663_v5 }
 0x8d2   :  { %v675_v7 = vmul.f32 %v1455_v59, %v674_v6 }
 0x8d4   :  { %v679_v9 = vsel %vm678_vm4, %v1455_v59, %v675_v7 }
 0x8d5   :  { %v690_v13 = vmul.f32 %v679_v9, %v656_v46 }
 0x8d7   :  { %v695_v14 = vmul.f32 %v1408_v8, %v690_v13 }
 0x8d9   :  { %v700_v15 = vadd.f32 %v1409_v11, %v695_v14 }
 0x8db   :  { %1350 = vmatmul.msk.f32.vlgmr.msra.gmra.mxu1 %vm65_vm0, %v700_v15 }
 0x943   :  { %v665_v16 = vpop.xlane.xlu2 %664 }
 0x944   :  { %v667_v17 = vmul.f32 %v665_v16, %v1602_v10 }
 0x946   :  { %v669_v18 = vadd.f32 1e-05, %v667_v17 }
 0x948   :  { %1456 = vrsqrt.f32 %v669_v18  ;;  %vm686_vm6 = vweird.f32 %v669_v18 }
 0x94e   :  { %v1457_v19 = vpop.eup %1456 }
 0x94f   :  { %v681_v20 = vmul.f32 %v1457_v19, %v669_v18  ;;  %vm687_vm5 = vweird.f32 %v1457_v19 }
 0x950   :  { %vm688_vm7 = vmor %vm686_vm6, %vm687_vm5 }
 0x951   :  { %v682_v0 = vmul.f32 %v1457_v19, %v681_v20 }
 0x953   :  { %v683_v22 = vmul.f32 0.5, %v682_v0 }
 0x955   :  { %v684_v23 = vsub.f32 1.5, %v683_v22 }
 0x957   :  { %v685_v1 = vmul.f32 %v1457_v19, %v684_v23 }
 0x958   :  { %v735_v26 = vpop.f32.mrf.mxu1 }
 0x959   :  { %v689_v27 = vsel %vm688_vm7, %v1457_v19, %v685_v1  ;;  %v736_v28 = vadd.f32 %v1417_v25, %v735_v26 }
 0x95a   :  { %v691_v29 = vmul.f32 %v689_v27, %v657_v62  ;;  %v1367_v27 = vld [vmem:[%s2069_s6 + $0x38] sm:$0xff] }
 0x95b   :  { %810 = vrot.lane.b32.xlu0 %v736_v28, %s1488_s20  ;;  %808 = vrot.lane.b32.xlu1 %v736_v28, %s1487_s2 }
 0x95c   :  { %742 = vrot.lane.b32.xlu2 %v736_v28, %s1489_s21  ;;  %v696_v30 = vmul.f32 %v1408_v8, %v691_v29  ;;  %v1365_v29 = vld [vmem:[%s2069_s6 + $0x28] sm:$0xff] }
 0x95e   :  { %v701_v31 = vadd.f32 %v1409_v11, %v696_v30  ;;  %v1364_v30 = vld [vmem:[%s2069_s6 + $0x20] sm:$0xff] }
 0x960   :  { %1351 = vmatmul.msk.f32.gmra.mxu1 %vm65_vm0, %v701_v31 }
 0x9b6   :  { %v743_v32 = vpop.permute.xlu2 %742 }
 0x9b7   :  { %1352 = vmatpush.xpose.msk.msra.mxu3 %vm167_vm8, %v743_v32 }
 0x9ba   :  { %1353 = vmatmul.msk.f32.vlgmr.msra.gmra.mxu3 %vm167_vm8, %v736_v28 }
 0x9cd   :  { %v811_v33 = vpop.permute.xlu0 %810  ;;  %v809_v34 = vpop.permute.xlu1 %808 }
 0x9ce   :  { %1355 = vmatpush.xpose.msk.msrb.mxu1 %vm167_vm8, %v811_v33 }
 0x9d1   :  { %1356 = vmatmul.msk.f32.vlgmr.msrb.gmra.mxu1 %vm167_vm8, %v809_v34 }
 0x9dd   :  { %v738_v39 = vpop.f32.mrf.mxu1 }
 0x9de   :  { %v1867_v45 = vadd.f32 %v1417_v25, %v738_v39 }
 0xa3d   :  { %v765_v35 = vpop.f32.mrf.mxu3 }
 0xa3e   :  { %v768_v36 = vmul.f32 0.25, %v765_v35 }
 0xa40   :  { %v769_v37 = vadd.f32 %v768_v36, %v1664_v4 }
 0xa42   :  { %v770_v38 = vsel %vm194_vm9, %v769_v37, -inf }
 0xa43   :  { %771 = vmax.xlane.f32.xlu1 %v770_v38 }
 0xa4e   :  { %v833_v40 = vpop.f32.mrf.mxu1 }
 0xa4f   :  { %v836_v41 = vmul.f32 0.25, %v833_v40 }
 0xa51   :  { %v837_v43 = vadd.f32 %v836_v41, %v1664_v4  ;;  %v1418_v41 = vld [vmem:[%s2070_s7 + $0x1] ss:$0 sm:$0xff] }
 0xa53   :  { %v838_v44 = vsel %vm194_vm9, %v837_v43, -inf }
 0xa54   :  { %839 = vmax.xlane.f32.xlu0 %v838_v44 }
 0xa5c   :  { %949 = vrot.lane.b32.xlu1 %v1867_v45, %s1488_s20 }
 0xa64   :  { %781 = vrot.lane.b32.xlu1 %v736_v28, %s1490_s22 }
 0xa68   :  { %849 = vrot.lane.b32.xlu0 %v736_v28, %s2095_s5  ;;  %v1366_v28 = vld [vmem:[%s2069_s6 + $0x30] sm:$0xff] }
 0xab6   :  { %v772_v46 = vpop.xlane.xlu1 %771 }
 0xab7   :  { %v773_v47 = vsub.f32 %v769_v37, %v772_v46 }
 0xab9   :  { %v774_v48 = vmul.f32 1.442695, %v773_v47 }
 0xabb   :  { %1458 = vpow2.f32 %v774_v48 }
 0xac1   :  { %v1459_v49 = vpop.eup %1458 }
 0xac2   :  { %v776_v50 = vsel %vm194_vm9, %v1459_v49, 0.0 }
 0xac3   :  { %777 = vadd.xlane.f32.xlu0 %v776_v50 }
 0xac7   :  { %v840_v4 = vpop.xlane.xlu0 %839 }
 0xac8   :  { %v841_v51 = vsub.f32 %v837_v43, %v840_v4 }
 0xaca   :  { %v842_v52 = vmul.f32 1.442695, %v841_v51 }
 0xacc   :  { %1460 = vpow2.f32 %v842_v52 }
 0xace   :  { %v950_v53 = vpop.permute.xlu1 %949 }
 0xad2   :  { %v1461_v21 = vpop.eup %1460 }
 0xad3   :  { %v844_v54 = vsel %vm194_vm9, %v1461_v21, 0.0 }
 0xad4   :  { %845 = vadd.xlane.f32.xlu2 %v844_v54  ;;  %v1375_v54 = vld [vmem:[%s2073_s10 + $0x30] sm:$0xff] }
 0xad6   :  { %v782_v55 = vpop.permute.xlu1 %781 }
 0xad7   :  { %802 = vmatpush.msra.mxu0 %v782_v55 }
 0xada   :  { %v850_v56 = vpop.permute.xlu0 %849 }
 0xadb   :  { %870 = vmatpush.msrb.mxu3 %v850_v56  ;;  %v1374_v56 = vld [vmem:[%s2073_s10 + $0x28] sm:$0xff] }
 0xadd   :  { %1361 = vmatpush.xpose.msk.msra.mxu3 %vm167_vm8, %v950_v53  ;;  %v1376_v53 = vld [vmem:[%s2073_s10 + $0x38] sm:$0xff] }
 0xaec   :  { %947 = vrot.lane.b32.xlu2 %v1867_v45, %s1487_s2 }
 0xaf4   :  { %881 = vrot.lane.b32.xlu2 %v1867_v45, %s1489_s21 }
 0xb36   :  { %v778_v57 = vpop.xlane.xlu0 %777 }
 0xb37   :  { %1462 = vrcp.f32 %v778_v57  ;;  %v1373_v57 = vld [vmem:[%s2073_s10 + $0x20] sm:$0xff] }
 0xb3d   :  { %v1463_v58 = vpop.eup %1462 }
 0xb3e   :  { %v780_v59 = vmul.f32 %v1463_v58, %v1459_v49 }
 0xb40   :  { %1354 = vmatmul.msk.f32.vlgmr.msra.gmra.mxu0 %vm194_vm9, %v780_v59 }
 0xb47   :  { %v846_v60 = vpop.xlane.xlu2 %845 }
 0xb48   :  { %1464 = vrcp.f32 %v846_v60 }
 0xb4e   :  { %v1465_v61 = vpop.eup %1464 }
 0xb4f   :  { %v848_v62 = vmul.f32 %v1465_v61, %v1461_v21  ;;  %v948_v63 = vpop.permute.xlu2 %947 }
 0xb51   :  { %1357 = vmatmul.msk.f32.vlgmr.msrb.gmra.mxu3 %vm194_vm9, %v848_v62 }
 0xb52   :  { %1148 = vmatpush.msrb.mxu3 %v1376_v53 }
 0xb54   :  { %1149 = vmatpush.msrb.mxu3 %v1375_v54 }
 0xb56   :  { %1150 = vmatpush.msrb.mxu3 %v1374_v56 }
 0xb57   :  { %v882_v2 = vpop.permute.xlu2 %881 }
 0xb58   :  { %1358 = vmatpush.xpose.msk.msrb.mxu0 %vm167_vm8, %v882_v2  ;;  %1151 = vmatpush.msrb.mxu3 %v1373_v57 }
 0xb59   :  { %1362 = vmatmul.msk.f32.vlgmr.msra.gmra.mxu3 %vm167_vm8, %v948_v63 }
 0xb5b   :  { %1359 = vmatmul.msk.f32.vlgmr.msrb.gmra.mxu0 %vm167_vm8, %v1867_v45 }
 0xbbd   :  { %v804_v3 = vpop.f32.mrf.mxu0 }
 0xbbe   :  { %807 = vst.msk [vmem:[#allocation2] sm:$0xff] %vm167_vm8, %v804_v3  ;;  %v1950_v3 = vld [vmem:[%s2071_s8 + $0x1] sm:$0x1] }
 0xbd4   :  { %v872_v5 = vpop.f32.mrf.mxu3 }
 0xbd8   :  { %v904_v6 = vpop.f32.mrf.mxu0 }
 0xbd9   :  { %v907_v7 = vmul.f32 0.25, %v904_v6 }
 0xbdb   :  { %v908_v8 = vadd.f32 %v907_v7, %v1676_v24  ;;  %v1111_v7 = vperm.slane %v1950_v3, 0 }
 0xbdc   :  { %v972_v9 = vpop.f32.mrf.mxu3 }
 0xbdd   :  { %v975_v11 = vmul.f32 0.25, %v972_v9  ;;  %v909_v13 = vsel %vm194_vm9, %v908_v8, -inf  ;;  %v1956_v9 = vld [vmem:[%s2072_s9 + $0x1] ss:$0 sm:$0xff] }
 0xbde   :  { %910 = vmax.xlane.f32.xlu2 %v909_v13 }
 0xbdf   :  { %v976_v14 = vadd.f32 %v975_v11, %v1676_v24 }
 0xbe1   :  { %v977_v15 = vsel %vm194_vm9, %v976_v14, -inf }
 0xbe2   :  { %978 = vmax.xlane.f32.xlu1 %v977_v15  ;;  %v1395_v15 = vld [vmem:[%s2075_s12 + $0xf8] sm:$0xff] }
 0xbe3   :  { %1194 = vmatpush.msra.mxu2 %v1395_v15 }
 0xbf6   :  { %920 = vrot.lane.b32.xlu2 %v1867_v45, %s1490_s22 }
 0xc51   :  { %v911_v16 = vpop.xlane.xlu2 %910 }
 0xc52   :  { %v912_v17 = vsub.f32 %v908_v8, %v911_v16  ;;  %v1394_v16 = vld [vmem:[%s2075_s12 + $0xf0] sm:$0xff] }
 0xc53   :  { %1195 = vmatpush.msra.mxu2 %v1394_v16 }
 0xc54   :  { %v913_v18 = vmul.f32 1.442695, %v912_v17  ;;  %v1393_v17 = vld [vmem:[%s2075_s12 + $0xe8] sm:$0xff] }
 0xc55   :  { %v979_v19 = vpop.xlane.xlu1 %978  ;;  %1196 = vmatpush.msra.mxu2 %v1393_v17 }
 0xc56   :  { %1466 = vpow2.f32 %v913_v18  ;;  %v980_v20 = vsub.f32 %v976_v14, %v979_v19  ;;  %v1392_v18 = vld [vmem:[%s2075_s12 + $0xe0] sm:$0xff] }
 0xc57   :  { %1197 = vmatpush.msra.mxu2 %v1392_v18 }
 0xc58   :  { %v981_v0 = vmul.f32 1.442695, %v980_v20 }
 0xc59   :  { %v921_v22 = vpop.permute.xlu2 %920 }
 0xc5a   :  { %1468 = vpow2.f32 %v981_v0  ;;  %941 = vmatpush.msra.mxu1 %v921_v22 }
 0xc5c   :  { %v1467_v23 = vpop.eup %1466  ;;  %1049 = vmatpush.msrb.mxu1 %v1367_v27  ;;  %v1387_v27 = vld [vmem:[%s2075_s12 + $0xb8] sm:$0xff] }
 0xc5d   :  { %v915_v25 = vsel %vm194_vm9, %v1467_v23, 0.0 }
 0xc5e   :  { %916 = vadd.xlane.f32.xlu1 %v915_v25  ;;  %1050 = vmatpush.msrb.mxu1 %v1366_v28  ;;  %v1391_v25 = vld [vmem:[%s2075_s12 + $0xd8] sm:$0xff]  ;;  %v1386_v28 = vld [vmem:[%s2075_s12 + $0xb0] sm:$0xff] }
 0xc5f   :  { %1198 = vmatpush.msra.mxu2 %v1391_v25 }
 0xc60   :  { %v1469_v24 = vpop.eup %1468  ;;  %1051 = vmatpush.msrb.mxu1 %v1365_v29  ;;  %v1385_v29 = vld [vmem:[%s2075_s12 + $0xa8] sm:$0xff] }
 0xc61   :  { %v983_v1 = vsel %vm194_vm9, %v1469_v24, 0.0 }
 0xc62   :  { %984 = vadd.xlane.f32.xlu0 %v983_v1  ;;  %1052 = vmatpush.msrb.mxu1 %v1364_v30  ;;  %v1389_v1 = vld [vmem:[%s2075_s12 + $0xc8] sm:$0xff]  ;;  %v1384_v30 = vld [vmem:[%s2075_s12 + $0xa0] sm:$0xff] }
 0xc76   :  { %988 = vrot.lane.b32.xlu0 %v1867_v45, %s2095_s5 }
 0xc7e   :  { %876 = vrot.lane.b32.xlu0 %v872_v5, %s2096_s30 }
 0xcd1   :  { %v917_v26 = vpop.xlane.xlu1 %916 }
 0xcd2   :  { %1470 = vrcp.f32 %v917_v26  ;;  %v1388_v26 = vld [vmem:[%s2075_s12 + $0xc0] sm:$0xff] }
 0xcd5   :  { %v985_v33 = vpop.xlane.xlu0 %984 }
 0xcd6   :  { %1472 = vrcp.f32 %v985_v33  ;;  %v1381_v33 = vld [vmem:[%s2075_s12 + $0x88] sm:$0xff] }
 0xcd8   :  { %v1471_v31 = vpop.eup %1470 }
 0xcd9   :  { %v919_v32 = vmul.f32 %v1471_v31, %v1467_v23  ;;  %v1383_v31 = vld [vmem:[%s2075_s12 + $0x98] sm:$0xff] }
 0xcdb   :  { %1360 = vmatmul.msk.f32.vlgmr.msra.gmra.mxu1 %vm194_vm9, %v919_v32  ;;  %v1382_v32 = vld [vmem:[%s2075_s12 + $0x90] sm:$0xff] }
 0xcdc   :  { %v1473_v34 = vpop.eup %1472 }
 0xcdd   :  { %v987_v35 = vmul.f32 %v1473_v34, %v1469_v24  ;;  %v1390_v24 = vld [vmem:[%s2075_s12 + $0xd0] sm:$0xff]  ;;  %v1380_v34 = vld [vmem:[%s2075_s12 + $0x80] sm:$0xff] }
 0xcde   :  { %1199 = vmatpush.msra.mxu2 %v1390_v24  ;;  %v1283_v24 = vld [vmem:[%s2079_s16 + $0x8] sm:$0xff] }
 0xce0   :  { %1200 = vmatpush.msra.mxu2 %v1389_v1  ;;  %v1282_v1 = vld [vmem:[%s2079_s16] sm:$0xff] }
 0xce2   :  { %1201 = vmatpush.msra.mxu2 %v1388_v26 }
 0xce4   :  { %1202 = vmatpush.msra.mxu2 %v1387_v27 }
 0xce6   :  { %1203 = vmatpush.msra.mxu2 %v1386_v28 }
 0xce8   :  { %v989_v36 = vpop.permute.xlu0 %988  ;;  %1204 = vmatpush.msra.mxu2 %v1385_v29 }
 0xce9   :  { %1009 = vmatpush.msra.mxu0 %v989_v36 }
 0xcea   :  { %1363 = vmatmul.msk.f32.vlgmr.msra.gmra.mxu0 %vm194_vm9, %v987_v35  ;;  %1205 = vmatpush.msra.mxu2 %v1384_v30  ;;  %v1419_v35 = vld [vmem:[%s2074_s11 + $0x1] ss:$0 sm:$0xff] }
 0xcec   :  { %1206 = vmatpush.msra.mxu2 %v1383_v31 }
 0xcee   :  { %1207 = vmatpush.msra.mxu2 %v1382_v32 }
 0xcf0   :  { %v877_v37 = vpop.permute.xlu0 %876  ;;  %1208 = vmatpush.msra.mxu2 %v1381_v33 }
 0xcf1   :  { %879 = vst.msk [vmem:[#allocation2] sm:$0xff] %vm304_vm10, %v877_v37 }
 0xcf2   :  { %1209 = vmatpush.msra.mxu2 %v1380_v34 }
 0xcf8   :  { %v1019_v38 = vld [vmem:[#allocation2] sm:$0xff] }
 0xcf9   :  { %1369 = vmatmul.msk.f32.vlgmr.msrb.gmra.mxu1 %vm65_vm0, %v1019_v38 }
 0xd58   :  { %v943_v39 = vpop.f32.mrf.mxu1 }
 0xd59   :  { %946 = vst.msk [vmem:[#allocation2 + $0x8] sm:$0xff] %vm167_vm8, %v943_v39 }
 0xd67   :  { %v1011_v40 = vpop.f32.mrf.mxu0 }
 0xd68   :  { %1015 = vrot.lane.b32.xlu1 %v1011_v40, %s2096_s30 }
 0xd76   :  { %v1054_v43 = vpop.f32.mrf.mxu1 }
 0xd77   :  { %v1055_v44 = vadd.f32 %v1418_v41, %v1054_v43 }
 0xd79   :  { %v1920_v45 = vadd.f32 %v1055_v44, %v1816_v42 }
 0xd7b   :  { %v1066_v46 = vsel %vm65_vm0, %v1920_v45, 0.0 }
 0xd7c   :  { %1067 = vadd.xlane.f32.xlu0 %v1066_v46 }
 0xdda   :  { %v1016_v47 = vpop.permute.xlu1 %1015 }
 0xddb   :  { %1018 = vst.msk [vmem:[#allocation2 + $0x8] sm:$0xff] %vm304_vm10, %v1016_v47 }
 0xde2   :  { %v1020_v48 = vld [vmem:[#allocation2 + $0x8] sm:$0xff] }
 0xde3   :  { %1370 = vmatmul.msk.f32.gmra.mxu1 %vm65_vm0, %v1020_v48 }
 0xdef   :  { %v1068_v49 = vpop.xlane.xlu0 %1067 }
 0xdf0   :  { %v1072_v50 = vmul.f32 %v1068_v49, %v1602_v10 }
 0xdf2   :  { %v1074_v4 = vsub.f32 %v1920_v45, %v1072_v50 }
 0xdf4   :  { %v1076_v51 = vmul.f32 %v1074_v4, %v1074_v4 }
 0xdf6   :  { %v1078_v52 = vsel %vm65_vm0, %v1076_v51, 0.0 }
 0xdf7   :  { %1079 = vadd.xlane.f32.xlu1 %v1078_v52 }
 0xe60   :  { %v1057_v42 = vpop.f32.mrf.mxu1 }
 0xe61   :  { %v1058_v21 = vadd.f32 %v1418_v41, %v1057_v42 }
 0xe63   :  { %v1936_v55 = vadd.f32 %v1058_v21, %v1824_v12 }
 0xe65   :  { %v1069_v58 = vsel %vm65_vm0, %v1936_v55, 0.0 }
 0xe66   :  { %1070 = vadd.xlane.f32.xlu2 %v1069_v58 }
 0xe6a   :  { %v1080_v59 = vpop.xlane.xlu1 %1079 }
 0xe6b   :  { %v1084_v60 = vmul.f32 %v1080_v59, %v1602_v10 }
 0xe6d   :  { %v1086_v12 = vadd.f32 1e-05, %v1084_v60  ;;  %v1420_v60 = vld [vmem:[%s2076_s13 + $0x1] ss:$0 sm:$0xff] }
 0xe6f   :  { %1474 = vrsqrt.f32 %v1086_v12  ;;  %vm1094_vm9 = vweird.f32 %v1086_v12 }
 0xe75   :  { %v1475_v61 = vpop.eup %1474 }
 0xe76   :  { %v1089_v62 = vmul.f32 %v1475_v61, %v1086_v12  ;;  %vm1095_vm8 = vweird.f32 %v1475_v61 }
 0xe77   :  { %vm1096_vm10 = vmor %vm1094_vm9, %vm1095_vm8 }
 0xe78   :  { %v1090_v63 = vmul.f32 %v1475_v61, %v1089_v62 }
 0xe7a   :  { %v1091_v2 = vmul.f32 0.5, %v1090_v63 }
 0xe7c   :  { %v1092_v5 = vsub.f32 1.5, %v1091_v2 }
 0xe7e   :  { %v1093_v6 = vmul.f32 %v1475_v61, %v1092_v5 }
 0xe80   :  { %v1097_v8 = vsel %vm1096_vm10, %v1475_v61, %v1093_v6 }
 0xe81   :  { %v1108_v11 = vmul.f32 %v1097_v8, %v1074_v4 }
 0xe83   :  { %v1113_v13 = vmul.f32 %v1111_v7, %v1108_v11 }
 0xe85   :  { %v1118_v14 = vadd.f32 %v1956_v9, %v1113_v13 }
 0xe87   :  { %1378 = vmatmul.msk.f32.vlgmr.msrb.gmra.mxu3 %vm65_vm0, %v1118_v14 }
 0xed9   :  { %v1071_v19 = vpop.xlane.xlu2 %1070 }
 0xeda   :  { %v1073_v20 = vmul.f32 %v1071_v19, %v1602_v10 }
 0xedc   :  { %v1075_v0 = vsub.f32 %v1936_v55, %v1073_v20 }
 0xede   :  { %v1077_v22 = vmul.f32 %v1075_v0, %v1075_v0 }
 0xee0   :  { %v1081_v23 = vsel %vm65_vm0, %v1077_v22, 0.0 }
 0xee1   :  { %1082 = vadd.xlane.f32.xlu0 %v1081_v23  ;;  %v1284_v23 = vld [vmem:[%s2079_s16 + $0x10] sm:$0xff] }
 0xf0a   :  { %v1153_v36 = vpop.f32.mrf.mxu3 }
 0xf0b   :  { %v1154_v37 = vadd.f32 %v1419_v35, %v1153_v36 }
 0xf0d   :  { %v1161_v38 = vmul.f32 0.044715, %v1154_v37  ;;  %v1159_v46 = vmul.f32 0.5, %v1154_v37 }
 0xf0f   :  { %v1163_v39 = vmul.f32 %v1161_v38, %v1154_v37  ;;  %v1422_v38 = vld [vmem:[%s2078_s15] ss:$0 sm:$0xff] }
 0xf11   :  { %v1165_v40 = vmul.f32 %v1163_v39, %v1154_v37 }
 0xf13   :  { %v1167_v41 = vadd.f32 %v1165_v40, %v1154_v37 }
 0xf15   :  { %v1169_v43 = vmul.f32 0.7978846, %v1167_v41 }
 0xf17   :  { %1476 = vtanh.f32 %v1169_v43 }
 0xf1d   :  { %v1477_v44 = vpop.eup %1476 }
 0xf1e   :  { %v1173_v47 = vadd.f32 1.0, %v1477_v44 }
 0xf20   :  { %v1175_v48 = vmul.f32 %v1173_v47, %v1159_v46 }
 0xf22   :  { %1210 = vmatmul.f32.vlgmr.msra.gmra.mxu2 %v1175_v48  ;;  %v1423_v48 = vld [vmem:[%s2080_s17] ss:$0 sm:$0xff] }
 0xf54   :  { %v1083_v49 = vpop.xlane.xlu0 %1082 }
 0xf55   :  { %v1085_v50 = vmul.f32 %v1083_v49, %v1602_v10 }
 0xf57   :  { %v1087_v4 = vadd.f32 1e-05, %v1085_v50 }
 0xf59   :  { %1478 = vrsqrt.f32 %v1087_v4  ;;  %vm1104_vm12 = vweird.f32 %v1087_v4 }
 0xf5f   :  { %v1479_v51 = vpop.eup %1478 }
 0xf60   :  { %v1099_v52 = vmul.f32 %v1479_v51, %v1087_v4  ;;  %vm1105_vm11 = vweird.f32 %v1479_v51 }
 0xf61   :  { %vm1106_vm13 = vmor %vm1104_vm12, %vm1105_vm11 }
 0xf62   :  { %v1100_v42 = vmul.f32 %v1479_v51, %v1099_v52 }
 0xf64   :  { %v1101_v53 = vmul.f32 0.5, %v1100_v42 }
 0xf66   :  { %v1102_v21 = vsub.f32 1.5, %v1101_v53 }
 0xf68   :  { %v1103_v54 = vmul.f32 %v1479_v51, %v1102_v21 }
 0xf6a   :  { %v1107_v56 = vsel %vm1106_vm13, %v1479_v51, %v1103_v54 }
 0xf6b   :  { %v1109_v57 = vmul.f32 %v1107_v56, %v1075_v0  ;;  %v1285_v0 = vld [vmem:[%s2079_s16 + $0x18] sm:$0xff] }
 0xf6c   :  { %1308 = vmatpush.msrb.mxu0 %v1285_v0 }
 0xf6d   :  { %v1114_v58 = vmul.f32 %v1111_v7, %v1109_v57 }
 0xf6e   :  { %1309 = vmatpush.msrb.mxu0 %v1284_v23 }
 0xf6f   :  { %v1119_v59 = vadd.f32 %v1956_v9, %v1114_v58 }
 0xf70   :  { %1310 = vmatpush.msrb.mxu0 %v1283_v24 }
 0xf71   :  { %1379 = vmatmul.msk.f32.gmra.mxu3 %vm65_vm0, %v1119_v59 }
 0xf72   :  { %1311 = vmatpush.msrb.mxu0 %v1282_v1 }
 0xfa5   :  { %v1211_v12 = vpop.f32.mrf.mxu2 }
 0xfa6   :  { %v1217_v61 = vadd.f32 %v1211_v12, %v1920_v45 }
 0xfa8   :  { %v1224_v62 = vadd.f32 %v1420_v60, %v1217_v61 }
 0xfaa   :  { %v1228_v63 = vsel %vm65_vm0, %v1224_v62, 0.0 }
 0xfab   :  { %1229 = vadd.xlane.f32.xlu2 %v1228_v63 }
 0xff4   :  { %v1156_v2 = vpop.f32.mrf.mxu3 }
 0xff5   :  { %v1157_v5 = vadd.f32 %v1419_v35, %v1156_v2  ;;  %v1421_v35 = vld [vmem:[%s2077_s14] ss:$0 sm:$0xff] }
 0xff7   :  { %v1162_v6 = vmul.f32 0.044715, %v1157_v5  ;;  %v1160_v13 = vmul.f32 0.5, %v1157_v5 }
 0xff9   :  { %v1164_v3 = vmul.f32 %v1162_v6, %v1157_v5 }
 0xffb   :  { %v1166_v7 = vmul.f32 %v1164_v3, %v1157_v5 }
 0xffd   :  { %v1168_v8 = vadd.f32 %v1166_v7, %v1157_v5 }
 0xfff   :  { %v1170_v9 = vmul.f32 0.7978846, %v1168_v8 }
0x1001   :  { %1480 = vtanh.f32 %v1170_v9 }
0x1007   :  { %v1481_v11 = vpop.eup %1480 }
0x1008   :  { %v1174_v14 = vadd.f32 1.0, %v1481_v11 }
0x100a   :  { %v1176_v15 = vmul.f32 %v1174_v14, %v1160_v13 }
0x100c   :  { %1213 = vmatmul.f32.gmra.mxu2 %v1176_v15 }
0x101e   :  { %v1230_v16 = vpop.xlane.xlu2 %1229 }
0x101f   :  { %v1234_v45 = vmul.f32 %v1230_v16, %v1602_v10 }
0x1021   :  { %v1236_v17 = vsub.f32 %v1224_v62, %v1234_v45 }
0x1023   :  { %v1238_v18 = vmul.f32 %v1236_v17, %v1236_v17 }
0x1025   :  { %v1240_v19 = vsel %vm65_vm0, %v1238_v18, 0.0 }
0x1026   :  { %1241 = vadd.xlane.f32.xlu2 %v1240_v19 }
0x108f   :  { %v1214_v20 = vpop.f32.mrf.mxu2 }
0x1090   :  { %v1218_v22 = vadd.f32 %v1214_v20, %v1936_v55 }
0x1092   :  { %v1225_v25 = vadd.f32 %v1420_v60, %v1218_v22 }
0x1094   :  { %v1231_v26 = vsel %vm65_vm0, %v1225_v25, 0.0 }
0x1095   :  { %1232 = vadd.xlane.f32.xlu0 %v1231_v26 }
0x1099   :  { %v1242_v55 = vpop.xlane.xlu2 %1241 }
0x109a   :  { %v1246_v27 = vmul.f32 %v1242_v55, %v1602_v10 }
0x109c   :  { %v1248_v28 = vadd.f32 1e-05, %v1246_v27 }
0x109e   :  { %1482 = vrsqrt.f32 %v1248_v28  ;;  %vm1256_vm15 = vweird.f32 %v1248_v28 }
0x10a4   :  { %v1483_v29 = vpop.eup %1482 }
0x10a5   :  { %v1251_v30 = vmul.f32 %v1483_v29, %v1248_v28  ;;  %vm1257_vm14 = vweird.f32 %v1483_v29 }
0x10a6   :  { %vm1258_vm1 = vmor %vm1256_vm15, %vm1257_vm14 }
0x10a7   :  { %v1252_v31 = vmul.f32 %v1483_v29, %v1251_v30 }
0x10a9   :  { %v1253_v32 = vmul.f32 0.5, %v1252_v31 }
0x10ab   :  { %v1254_v33 = vsub.f32 1.5, %v1253_v32 }
0x10ad   :  { %v1255_v34 = vmul.f32 %v1483_v29, %v1254_v33 }
0x10af   :  { %v1259_v36 = vsel %vm1258_vm1, %v1483_v29, %v1255_v34 }
0x10b0   :  { %v1270_v37 = vmul.f32 %v1259_v36, %v1236_v17 }
0x10b2   :  { %v1275_v39 = vmul.f32 %v1421_v35, %v1270_v37 }
0x10b4   :  { %v1280_v40 = vadd.f32 %v1422_v38, %v1275_v39 }
0x10b6   :  { %1397 = vmatmul.msk.f32.vlgmr.msrb.gmra.mxu0 %vm65_vm0, %v1280_v40 }
0x1108   :  { %v1233_v41 = vpop.xlane.xlu0 %1232 }
0x1109   :  { %v1235_v43 = vmul.f32 %v1233_v41, %v1602_v10 }
0x110b   :  { %v1237_v44 = vsub.f32 %v1225_v25, %v1235_v43 }
0x110d   :  { %v1239_v46 = vmul.f32 %v1237_v44, %v1237_v44 }
0x110f   :  { %v1243_v47 = vsel %vm65_vm0, %v1239_v46, 0.0 }
0x1110   :  { %1244 = vadd.xlane.f32.xlu0 %v1243_v47 }
0x1133   :  { %v1313_v49 = vpop.f32.mrf.mxu0 }
0x1134   :  { %v1314_v50 = vadd.f32 %v1423_v48, %v1313_v49 }
0x1136   :  { %1319 = vst [vmem:[%s2081_s18] sm:$0xff] %v1314_v50 }
0x1183   :  { %v1245_v4 = vpop.xlane.xlu0 %1244 }
0x1184   :  { %v1247_v51 = vmul.f32 %v1245_v4, %v1602_v10 }
0x1186   :  { %v1249_v52 = vadd.f32 1e-05, %v1247_v51 }
0x1188   :  { %1484 = vrsqrt.f32 %v1249_v52  ;;  %vm1266_vm3 = vweird.f32 %v1249_v52 }
0x118e   :  { %v1485_v42 = vpop.eup %1484 }
0x118f   :  { %v1261_v53 = vmul.f32 %v1485_v42, %v1249_v52  ;;  %vm1267_vm2 = vweird.f32 %v1485_v42 }
0x1190   :  { %vm1268_vm4 = vmor %vm1266_vm3, %vm1267_vm2 }
0x1191   :  { %v1262_v21 = vmul.f32 %v1485_v42, %v1261_v53 }
0x1193   :  { %v1263_v54 = vmul.f32 0.5, %v1262_v21 }
0x1195   :  { %v1264_v56 = vsub.f32 1.5, %v1263_v54 }
0x1197   :  { %v1265_v57 = vmul.f32 %v1485_v42, %v1264_v56 }
0x1199   :  { %v1269_v58 = vsel %vm1268_vm4, %v1485_v42, %v1265_v57 }
0x119a   :  { %v1271_v59 = vmul.f32 %v1269_v58, %v1237_v44 }
0x119c   :  { %v1276_v60 = vmul.f32 %v1421_v35, %v1271_v59 }
0x119e   :  { %v1281_v12 = vadd.f32 %v1422_v38, %v1276_v60 }
0x11a0   :  { %1398 = vmatmul.msk.f32.gmra.mxu0 %vm65_vm0, %v1281_v12 }
0x121d   :  { %v1316_v61 = vpop.f32.mrf.mxu0 }
0x121e   :  { %v1317_v62 = vadd.f32 %v1423_v48, %v1316_v61 }
0x1220   :  { %1320 = vst [vmem:[%s2081_s18 + $0x8] sm:$0xff] %v1317_v62 }

</bundles_post_ra>
